<compile_context>
chip_gen: v5e
topology: v5e:2x2
jax: 0.10.0
libtpu: 0.0.40
codegen_flags: <defaults>
</compile_context>

<pallas_src>
import math

import jax
import jax.numpy as jnp
import numpy as np
from jax.experimental import pallas as pl
from jax.experimental.pallas import tpu as pltpu


# ----------------------------------------------------------------------------
# Fused Pallas kernel: one batch element per grid step, everything in VMEM.
# ----------------------------------------------------------------------------
def _mine_fused_kernel(s_ref, x_ref, r1_ref, m1_ref, b1_ref, r2_ref, m2_ref,
                       b2_ref, ws_ref, bs_ref, wsf_ref, wz_ref, bc1_ref,
                       wc2_ref, bc2_ref, o_ref):
    f32 = jnp.float32
    x = x_ref[0]                                          # [28, 84] = (h, w*3+ic)

    # ---- conv1 (3->16, k=3, s=2, p=1) + ReLU -> y1 [14, 14*16] --------------
    acc1 = jnp.zeros((14, 224), f32)
    for kh in range(3):
        rows = jnp.dot(r1_ref[kh], x, preferred_element_type=f32)      # [14, 84]
        acc1 = acc1 + jnp.dot(rows, m1_ref[kh], preferred_element_type=f32)
    y1 = jnp.maximum(acc1 + b1_ref[...], 0.0)             # [14, 224] = (a, c*16+oc)

    # ---- conv2 (16->32, k=3, s=2, p=1) + ReLU -> y2 [7, 7*32] ---------------
    acc2 = jnp.zeros((7, 224), f32)
    for kh in range(3):
        rows = jnp.dot(r2_ref[kh], y1, preferred_element_type=f32)     # [7, 224]
        acc2 = acc2 + jnp.dot(rows, m2_ref[kh], preferred_element_type=f32)
    y2 = jnp.maximum(acc2 + b2_ref[...], 0.0)             # [7, 224] = (a2, c2*32+oc)

    # ---- fc_s: ReLU(s * W + b) as pure VPU work (no padded K=1 matmul) ------
    sv = s_ref[0]                                         # [1, 1]
    sf = jnp.maximum(sv * ws_ref[...] + bs_ref[...], 0.0)               # [1, 16]

    # ---- fc1: ReLU( flatten(y2) @ Wz + sf @ Wsf + b ) -----------------------
    # The row-major flatten of y2 is folded into the (pre-permuted) Wz rows,
    # so no in-kernel relayout is needed: accumulate 7 row-block matmuls.
    h = jnp.dot(sf, wsf_ref[...], preferred_element_type=f32) + bc1_ref[...]
    for a in range(7):
        h = h + jnp.dot(y2[a:a + 1, :], wz_ref[pl.ds(224 * a, 224), :],
                        preferred_element_type=f32)
    h = jnp.maximum(h, 0.0)                               # [1, 128]

    # ---- fc2 (128 -> 1): lane reduction instead of an N=1 matmul ------------
    out = jnp.sum(h * wc2_ref[...], axis=1, keepdims=True) + bc2_ref[...]
    o_ref[0] = out                                        # [1, 1]


# ----------------------------------------------------------------------------
# Parameter initialization (PyTorch default uniform bounds), torch layouts.
# ----------------------------------------------------------------------------
def init_params(key):
    def uni(k, shape, fan_in):
        bound = 1.0 / math.sqrt(fan_in)
        return jax.random.uniform(k, shape, jnp.float32, -bound, bound)

    ks = jax.random.split(key, 10)
    return {
        # torch layouts: conv [oc, ic, kh, kw], linear [out, in]
        "conv1_w": uni(ks[0], (16, 3, 3, 3), 3 * 9),
        "conv1_b": uni(ks[1], (16,), 3 * 9),
        "conv2_w": uni(ks[2], (32, 16, 3, 3), 16 * 9),
        "conv2_b": uni(ks[3], (32,), 16 * 9),
        "fcs_w": uni(ks[4], (16, 1), 1),
        "fcs_b": uni(ks[5], (16,), 1),
        "fc1_w": uni(ks[6], (128, 32 * 7 * 7 + 16), 32 * 7 * 7 + 16),
        "fc1_b": uni(ks[7], (128,), 32 * 7 * 7 + 16),
        "fc2_w": uni(ks[8], (1, 128), 128),
        "fc2_b": uni(ks[9], (1,), 128),
    }


# ----------------------------------------------------------------------------
# One-time conversion of torch-layout params into fused-kernel constants.
# ----------------------------------------------------------------------------
def to_kernel_params(p):
    w1 = np.asarray(p["conv1_w"], np.float32)   # [16, 3, 3, 3]  (oc, ic, kh, kw)
    w2 = np.asarray(p["conv2_w"], np.float32)   # [32, 16, 3, 3]

    # Row-selection matrices: R[kh, a, h] = 1  iff  h == 2*a + kh - 1 (pad=1).
    r1 = np.zeros((3, 14, 28), np.float32)
    r2 = np.zeros((3, 7, 14), np.float32)
    for kh in range(3):
        for a in range(14):
            h = 2 * a + kh - 1
            if 0 <= h < 28:
                r1[kh, a, h] = 1.0
        for a in range(7):
            h = 2 * a + kh - 1
            if 0 <= h < 14:
                r2[kh, a, h] = 1.0

    # Fused (column-selection x conv-weight) blocks:
    #   m1[kh, w*3+ic,  c*16+oc]  = sum_kw [w == 2c +kw-1] * w1[oc, ic, kh, kw]
    #   m2[kh, c*16+ic, c2*32+oc] = sum_kw [c == 2c2+kw-1] * w2[oc, ic, kh, kw]
    m1 = np.zeros((3, 84, 224), np.float32)
    m2 = np.zeros((3, 224, 224), np.float32)
    for kh in range(3):
        for kw in range(3):
            w1s = w1[:, :, kh, kw].T            # [ic=3, oc=16]
            w2s = w2[:, :, kh, kw].T            # [ic=16, oc=32]
            for c in range(14):
                w = 2 * c + kw - 1
                if 0 <= w < 28:
                    m1[kh, w * 3:w * 3 + 3, c * 16:c * 16 + 16] += w1s
            for c2 in range(7):
                c = 2 * c2 + kw - 1
                if 0 <= c < 14:
                    m2[kh, c * 16:c * 16 + 16, c2 * 32:c2 * 32 + 32] += w2s

    fc1_w = np.asarray(p["fc1_w"], np.float32)  # [128, 1584]
    # Pre-permute fc1 rows so the kernel's natural (a2, c2, oc) flatten order
    # matches torch's NCHW flatten -- the runtime transpose disappears.
    wz = fc1_w[:, :1568].reshape(128, 32, 7, 7).transpose(2, 3, 1, 0)
    wz = np.ascontiguousarray(wz).reshape(1568, 128)
    wsf = np.ascontiguousarray(fc1_w[:, 1568:].T)            # [16, 128]

    return {
        "R1": jnp.asarray(r1), "M1": jnp.asarray(m1),
        "b1": jnp.asarray(np.tile(np.asarray(p["conv1_b"], np.float32),
                                  14).reshape(1, 224)),
        "R2": jnp.asarray(r2), "M2": jnp.asarray(m2),
        "b2": jnp.asarray(np.tile(np.asarray(p["conv2_b"], np.float32),
                                  7).reshape(1, 224)),
        "ws": jnp.asarray(np.asarray(p["fcs_w"], np.float32)[:, 0].reshape(1, 16)),
        "bs": jnp.asarray(np.asarray(p["fcs_b"], np.float32).reshape(1, 16)),
        "Wsf": jnp.asarray(wsf),
        "Wz": jnp.asarray(wz),
        "bc1": jnp.asarray(np.asarray(p["fc1_b"], np.float32).reshape(1, 128)),
        "wc2": jnp.asarray(np.asarray(p["fc2_w"], np.float32).reshape(1, 128)),
        "bc2": jnp.asarray(np.asarray(p["fc2_b"], np.float32).reshape(1, 1)),
    }


# ----------------------------------------------------------------------------
# MINE forward (single fused Pallas call).
# ----------------------------------------------------------------------------
def mine_forward(kp, z_nchw, s):
    """z: [B, 3, 28, 28] (NCHW), s: [B].  Returns [B, 1]."""
    B = z_nchw.shape[0]
    # Only wrapper-side glue: NCHW -> [B, 28, 28*3] activation layout.
    x = jnp.transpose(z_nchw.astype(jnp.float32), (0, 2, 3, 1)).reshape(B, 28, 84)
    s3 = s.astype(jnp.float32).reshape(B, 1, 1)

    operands = (s3, x, kp["R1"], kp["M1"], kp["b1"], kp["R2"], kp["M2"],
                kp["b2"], kp["ws"], kp["bs"], kp["Wsf"], kp["Wz"], kp["bc1"],
                kp["wc2"], kp["bc2"])

    flops = 2 * B * (3 * (14 * 28 * 84 + 14 * 84 * 224)
                     + 3 * (7 * 14 * 224 + 7 * 224 * 224)
                     + 16 * 128 + 1568 * 128 + 128)
    bytes_accessed = sum(int(op.size) * 4 for op in operands) + B * 4

    const2 = lambda shape: pl.BlockSpec(shape, lambda b: (0, 0))
    const3 = lambda shape: pl.BlockSpec(shape, lambda b: (0, 0, 0))

    out = pl.pallas_call(
        _mine_fused_kernel,
        grid=(B,),
        in_specs=[
            pl.BlockSpec((1, 1, 1), lambda b: (b, 0, 0)),      # s
            pl.BlockSpec((1, 28, 84), lambda b: (b, 0, 0)),    # x
            const3((3, 14, 28)),      # R1
            const3((3, 84, 224)),     # M1
            const2((1, 224)),         # conv1 bias (tiled)
            const3((3, 7, 14)),       # R2
            const3((3, 224, 224)),    # M2
            const2((1, 224)),         # conv2 bias (tiled)
            const2((1, 16)),          # fc_s weight (row)
            const2((1, 16)),          # fc_s bias
            const2((16, 128)),        # fc1 weight, s-part
            const2((1568, 128)),      # fc1 weight, conv-part (pre-permuted)
            const2((1, 128)),         # fc1 bias
            const2((1, 128)),         # fc2 weight (row)
            const2((1, 1)),           # fc2 bias
        ],
        out_specs=pl.BlockSpec((1, 1, 1), lambda b: (b, 0, 0)),
        out_shape=jax.ShapeDtypeStruct((B, 1, 1), jnp.float32),
        compiler_params=pltpu.CompilerParams(
            dimension_semantics=("parallel",)),
        cost_estimate=pl.CostEstimate(flops=flops, transcendentals=0,
                                      bytes_accessed=bytes_accessed),
    )(*operands)
    return out.reshape(B, 1)


# ----------------------------------------------------------------------------
# Pure-JAX reference (for correctness check only)
# ----------------------------------------------------------------------------
def mine_forward_ref(p, z_nchw, s):
    def conv(x, w, b, stride):
        y = jax.lax.conv_general_dilated(
            x, w, (stride, stride), ((1, 1), (1, 1)),
            dimension_numbers=("NCHW", "OIHW", "NCHW"))
        return y + b.reshape(1, -1, 1, 1)

    B = z_nchw.shape[0]
    x = z_nchw.astype(jnp.float32)
    x = jax.nn.relu(conv(x, p["conv1_w"], p["conv1_b"], 2))
    x = jax.nn.relu(conv(x, p["conv2_w"], p["conv2_b"], 2))
    zf = x.reshape(B, -1)
    sf = jax.nn.relu(s.astype(jnp.float32).reshape(B, 1) @ p["fcs_w"].T
                     + p["fcs_b"])
    comb = jnp.concatenate([zf, sf], axis=1)
    h = jax.nn.relu(comb @ p["fc1_w"].T + p["fc1_b"])
    return h @ p["fc2_w"].T + p["fc2_b"]


if __name__ == "__main__":
    key = jax.random.PRNGKey(0)
    kz, ks_, kp_ = jax.random.split(key, 3)

    B = 2
    z = jax.random.normal(kz, (B, 3, 28, 28), jnp.float32)   # NCHW input
    s = jax.random.normal(ks_, (B,), jnp.float32)

    torch_params = init_params(kp_)
    kernel_params = to_kernel_params(torch_params)

    fwd = jax.jit(mine_forward)
    out = jax.block_until_ready(fwd(kernel_params, z, s))

    ref = jax.block_until_ready(mine_forward_ref(torch_params, z, s))
    assert out.shape == (B, 1)
    assert jnp.allclose(out, ref, atol=1e-3, rtol=1e-3), (out, ref)

    print("KERNEL_OK")
</pallas_src>

<mosaic_0001>
module attributes {stable_mosaic.version = 11 : i64} {
  func.func @_mine_fused_kernel(%arg0: i32, %arg1: memref<1x1x1xf32, #tpu.memory_space<vmem>>, %arg2: memref<1x28x84xf32, #tpu.memory_space<vmem>>, %arg3: memref<3x14x28xf32, #tpu.memory_space<vmem>>, %arg4: memref<3x84x224xf32, #tpu.memory_space<vmem>>, %arg5: memref<1x224xf32, #tpu.memory_space<vmem>>, %arg6: memref<3x7x14xf32, #tpu.memory_space<vmem>>, %arg7: memref<3x224x224xf32, #tpu.memory_space<vmem>>, %arg8: memref<1x224xf32, #tpu.memory_space<vmem>>, %arg9: memref<1x16xf32, #tpu.memory_space<vmem>>, %arg10: memref<1x16xf32, #tpu.memory_space<vmem>>, %arg11: memref<16x128xf32, #tpu.memory_space<vmem>>, %arg12: memref<1568x128xf32, #tpu.memory_space<vmem>>, %arg13: memref<1x128xf32, #tpu.memory_space<vmem>>, %arg14: memref<1x128xf32, #tpu.memory_space<vmem>>, %arg15: memref<1x1xf32, #tpu.memory_space<vmem>>, %arg16: memref<1x1x1xf32, #tpu.memory_space<vmem>>) attributes {dimension_semantics = [#tpu.dimension_semantics<parallel>], iteration_bounds = array<i64: 2>, scalar_prefetch = 0 : i64, scratch_operands = 0 : i64, tpu.core_type = #tpu.core_type<tc>, window_params = [{transform_indices = @transform_0, window_bounds = array<i64: 1, 1, 1>}, {transform_indices = @transform_1, window_bounds = array<i64: 1, 28, 84>}, {pipeline_mode = #tpu.pipeline_mode<synchronous>, transform_indices = @transform_2, window_bounds = array<i64: 3, 14, 28>}, {pipeline_mode = #tpu.pipeline_mode<synchronous>, transform_indices = @transform_3, window_bounds = array<i64: 3, 84, 224>}, {pipeline_mode = #tpu.pipeline_mode<synchronous>, transform_indices = @transform_4, window_bounds = array<i64: 1, 224>}, {pipeline_mode = #tpu.pipeline_mode<synchronous>, transform_indices = @transform_5, window_bounds = array<i64: 3, 7, 14>}, {pipeline_mode = #tpu.pipeline_mode<synchronous>, transform_indices = @transform_6, window_bounds = array<i64: 3, 224, 224>}, {pipeline_mode = #tpu.pipeline_mode<synchronous>, transform_indices = @transform_7, window_bounds = array<i64: 1, 224>}, {pipeline_mode = #tpu.pipeline_mode<synchronous>, transform_indices = @transform_8, window_bounds = array<i64: 1, 16>}, {pipeline_mode = #tpu.pipeline_mode<synchronous>, transform_indices = @transform_9, window_bounds = array<i64: 1, 16>}, {pipeline_mode = #tpu.pipeline_mode<synchronous>, transform_indices = @transform_10, window_bounds = array<i64: 16, 128>}, {pipeline_mode = #tpu.pipeline_mode<synchronous>, transform_indices = @transform_11, window_bounds = array<i64: 1568, 128>}, {pipeline_mode = #tpu.pipeline_mode<synchronous>, transform_indices = @transform_12, window_bounds = array<i64: 1, 128>}, {pipeline_mode = #tpu.pipeline_mode<synchronous>, transform_indices = @transform_13, window_bounds = array<i64: 1, 128>}, {pipeline_mode = #tpu.pipeline_mode<synchronous>, transform_indices = @transform_14, window_bounds = array<i64: 1, 1>}, {transform_indices = @transform_15, window_bounds = array<i64: 1, 1, 1>}]} {
    %c0 = arith.constant 0 : index
    %c0_0 = arith.constant 0 : index
    %c0_1 = arith.constant 0 : index
    %0 = vector.load %arg2[%c0, %c0_0, %c0_1] : memref<1x28x84xf32, #tpu.memory_space<vmem>>, vector<1x28x84xf32>
    %1 = vector.shape_cast %0 : vector<1x28x84xf32> to vector<28x84xf32>
    %cst = arith.constant 0.000000e+00 : f32
    %2 = vector.broadcast %cst : f32 to vector<14x224xf32>
    %c0_2 = arith.constant 0 : index
    %c0_3 = arith.constant 0 : index
    %c0_4 = arith.constant 0 : index
    %3 = vector.load %arg3[%c0_2, %c0_3, %c0_4] : memref<3x14x28xf32, #tpu.memory_space<vmem>>, vector<1x14x28xf32>
    %4 = vector.shape_cast %3 : vector<1x14x28xf32> to vector<14x28xf32>
    %cst_5 = arith.constant dense<0.000000e+00> : vector<14x84xf32>
    %5 = tpu.matmul %4, %1, %cst_5 {dimension_numbers = #tpu.dot_dimension_numbers<[1], [0], [0], [1], [0, 0, 1, 1], [], []>} : vector<14x28xf32>, vector<28x84xf32>, vector<14x84xf32> -> vector<14x84xf32>
    %c0_6 = arith.constant 0 : index
    %c0_7 = arith.constant 0 : index
    %c0_8 = arith.constant 0 : index
    %6 = vector.load %arg4[%c0_6, %c0_7, %c0_8] : memref<3x84x224xf32, #tpu.memory_space<vmem>>, vector<1x84x224xf32>
    %7 = vector.shape_cast %6 : vector<1x84x224xf32> to vector<84x224xf32>
    %cst_9 = arith.constant dense<0.000000e+00> : vector<14x224xf32>
    %8 = tpu.matmul %5, %7, %cst_9 {dimension_numbers = #tpu.dot_dimension_numbers<[1], [0], [0], [1], [0, 0, 1, 1], [], []>} : vector<14x84xf32>, vector<84x224xf32>, vector<14x224xf32> -> vector<14x224xf32>
    %9 = arith.addf %2, %8 : vector<14x224xf32>
    %c1 = arith.constant 1 : index
    %c0_10 = arith.constant 0 : index
    %c0_11 = arith.constant 0 : index
    %10 = vector.load %arg3[%c1, %c0_10, %c0_11] : memref<3x14x28xf32, #tpu.memory_space<vmem>>, vector<1x14x28xf32>
    %11 = vector.shape_cast %10 : vector<1x14x28xf32> to vector<14x28xf32>
    %cst_12 = arith.constant dense<0.000000e+00> : vector<14x84xf32>
    %12 = tpu.matmul %11, %1, %cst_12 {dimension_numbers = #tpu.dot_dimension_numbers<[1], [0], [0], [1], [0, 0, 1, 1], [], []>} : vector<14x28xf32>, vector<28x84xf32>, vector<14x84xf32> -> vector<14x84xf32>
    %c1_13 = arith.constant 1 : index
    %c0_14 = arith.constant 0 : index
    %c0_15 = arith.constant 0 : index
    %13 = vector.load %arg4[%c1_13, %c0_14, %c0_15] : memref<3x84x224xf32, #tpu.memory_space<vmem>>, vector<1x84x224xf32>
    %14 = vector.shape_cast %13 : vector<1x84x224xf32> to vector<84x224xf32>
    %cst_16 = arith.constant dense<0.000000e+00> : vector<14x224xf32>
    %15 = tpu.matmul %12, %14, %cst_16 {dimension_numbers = #tpu.dot_dimension_numbers<[1], [0], [0], [1], [0, 0, 1, 1], [], []>} : vector<14x84xf32>, vector<84x224xf32>, vector<14x224xf32> -> vector<14x224xf32>
    %16 = arith.addf %9, %15 : vector<14x224xf32>
    %c2 = arith.constant 2 : index
    %c0_17 = arith.constant 0 : index
    %c0_18 = arith.constant 0 : index
    %17 = vector.load %arg3[%c2, %c0_17, %c0_18] : memref<3x14x28xf32, #tpu.memory_space<vmem>>, vector<1x14x28xf32>
    %18 = vector.shape_cast %17 : vector<1x14x28xf32> to vector<14x28xf32>
    %cst_19 = arith.constant dense<0.000000e+00> : vector<14x84xf32>
    %19 = tpu.matmul %18, %1, %cst_19 {dimension_numbers = #tpu.dot_dimension_numbers<[1], [0], [0], [1], [0, 0, 1, 1], [], []>} : vector<14x28xf32>, vector<28x84xf32>, vector<14x84xf32> -> vector<14x84xf32>
    %c2_20 = arith.constant 2 : index
    %c0_21 = arith.constant 0 : index
    %c0_22 = arith.constant 0 : index
    %20 = vector.load %arg4[%c2_20, %c0_21, %c0_22] : memref<3x84x224xf32, #tpu.memory_space<vmem>>, vector<1x84x224xf32>
    %21 = vector.shape_cast %20 : vector<1x84x224xf32> to vector<84x224xf32>
    %cst_23 = arith.constant dense<0.000000e+00> : vector<14x224xf32>
    %22 = tpu.matmul %19, %21, %cst_23 {dimension_numbers = #tpu.dot_dimension_numbers<[1], [0], [0], [1], [0, 0, 1, 1], [], []>} : vector<14x84xf32>, vector<84x224xf32>, vector<14x224xf32> -> vector<14x224xf32>
    %23 = arith.addf %16, %22 : vector<14x224xf32>
    %c0_24 = arith.constant 0 : index
    %c0_25 = arith.constant 0 : index
    %24 = vector.load %arg5[%c0_24, %c0_25] : memref<1x224xf32, #tpu.memory_space<vmem>>, vector<1x224xf32>
    %25 = vector.broadcast %24 : vector<1x224xf32> to vector<14x224xf32>
    %26 = arith.addf %23, %25 : vector<14x224xf32>
    %cst_26 = arith.constant 0.000000e+00 : f32
    %27 = vector.broadcast %cst_26 : f32 to vector<14x224xf32>
    %28 = arith.maximumf %26, %27 : vector<14x224xf32>
    %cst_27 = arith.constant 0.000000e+00 : f32
    %29 = vector.broadcast %cst_27 : f32 to vector<7x224xf32>
    %c0_28 = arith.constant 0 : index
    %c0_29 = arith.constant 0 : index
    %c0_30 = arith.constant 0 : index
    %30 = vector.load %arg6[%c0_28, %c0_29, %c0_30] : memref<3x7x14xf32, #tpu.memory_space<vmem>>, vector<1x7x14xf32>
    %31 = vector.shape_cast %30 : vector<1x7x14xf32> to vector<7x14xf32>
    %cst_31 = arith.constant dense<0.000000e+00> : vector<7x224xf32>
    %32 = tpu.matmul %31, %28, %cst_31 {dimension_numbers = #tpu.dot_dimension_numbers<[1], [0], [0], [1], [0, 0, 1, 1], [], []>} : vector<7x14xf32>, vector<14x224xf32>, vector<7x224xf32> -> vector<7x224xf32>
    %c0_32 = arith.constant 0 : index
    %c0_33 = arith.constant 0 : index
    %c0_34 = arith.constant 0 : index
    %33 = vector.load %arg7[%c0_32, %c0_33, %c0_34] : memref<3x224x224xf32, #tpu.memory_space<vmem>>, vector<1x224x224xf32>
    %34 = vector.shape_cast %33 : vector<1x224x224xf32> to vector<224x224xf32>
    %cst_35 = arith.constant dense<0.000000e+00> : vector<7x224xf32>
    %35 = tpu.matmul %32, %34, %cst_35 {dimension_numbers = #tpu.dot_dimension_numbers<[1], [0], [0], [1], [0, 0, 1, 1], [], []>} : vector<7x224xf32>, vector<224x224xf32>, vector<7x224xf32> -> vector<7x224xf32>
    %36 = arith.addf %29, %35 : vector<7x224xf32>
    %c1_36 = arith.constant 1 : index
    %c0_37 = arith.constant 0 : index
    %c0_38 = arith.constant 0 : index
    %37 = vector.load %arg6[%c1_36, %c0_37, %c0_38] : memref<3x7x14xf32, #tpu.memory_space<vmem>>, vector<1x7x14xf32>
    %38 = vector.shape_cast %37 : vector<1x7x14xf32> to vector<7x14xf32>
    %cst_39 = arith.constant dense<0.000000e+00> : vector<7x224xf32>
    %39 = tpu.matmul %38, %28, %cst_39 {dimension_numbers = #tpu.dot_dimension_numbers<[1], [0], [0], [1], [0, 0, 1, 1], [], []>} : vector<7x14xf32>, vector<14x224xf32>, vector<7x224xf32> -> vector<7x224xf32>
    %c1_40 = arith.constant 1 : index
    %c0_41 = arith.constant 0 : index
    %c0_42 = arith.constant 0 : index
    %40 = vector.load %arg7[%c1_40, %c0_41, %c0_42] : memref<3x224x224xf32, #tpu.memory_space<vmem>>, vector<1x224x224xf32>
    %41 = vector.shape_cast %40 : vector<1x224x224xf32> to vector<224x224xf32>
    %cst_43 = arith.constant dense<0.000000e+00> : vector<7x224xf32>
    %42 = tpu.matmul %39, %41, %cst_43 {dimension_numbers = #tpu.dot_dimension_numbers<[1], [0], [0], [1], [0, 0, 1, 1], [], []>} : vector<7x224xf32>, vector<224x224xf32>, vector<7x224xf32> -> vector<7x224xf32>
    %43 = arith.addf %36, %42 : vector<7x224xf32>
    %c2_44 = arith.constant 2 : index
    %c0_45 = arith.constant 0 : index
    %c0_46 = arith.constant 0 : index
    %44 = vector.load %arg6[%c2_44, %c0_45, %c0_46] : memref<3x7x14xf32, #tpu.memory_space<vmem>>, vector<1x7x14xf32>
    %45 = vector.shape_cast %44 : vector<1x7x14xf32> to vector<7x14xf32>
    %cst_47 = arith.constant dense<0.000000e+00> : vector<7x224xf32>
    %46 = tpu.matmul %45, %28, %cst_47 {dimension_numbers = #tpu.dot_dimension_numbers<[1], [0], [0], [1], [0, 0, 1, 1], [], []>} : vector<7x14xf32>, vector<14x224xf32>, vector<7x224xf32> -> vector<7x224xf32>
    %c2_48 = arith.constant 2 : index
    %c0_49 = arith.constant 0 : index
    %c0_50 = arith.constant 0 : index
    %47 = vector.load %arg7[%c2_48, %c0_49, %c0_50] : memref<3x224x224xf32, #tpu.memory_space<vmem>>, vector<1x224x224xf32>
    %48 = vector.shape_cast %47 : vector<1x224x224xf32> to vector<224x224xf32>
    %cst_51 = arith.constant dense<0.000000e+00> : vector<7x224xf32>
    %49 = tpu.matmul %46, %48, %cst_51 {dimension_numbers = #tpu.dot_dimension_numbers<[1], [0], [0], [1], [0, 0, 1, 1], [], []>} : vector<7x224xf32>, vector<224x224xf32>, vector<7x224xf32> -> vector<7x224xf32>
    %50 = arith.addf %43, %49 : vector<7x224xf32>
    %c0_52 = arith.constant 0 : index
    %c0_53 = arith.constant 0 : index
    %51 = vector.load %arg8[%c0_52, %c0_53] : memref<1x224xf32, #tpu.memory_space<vmem>>, vector<1x224xf32>
    %52 = vector.broadcast %51 : vector<1x224xf32> to vector<7x224xf32>
    %53 = arith.addf %50, %52 : vector<7x224xf32>
    %cst_54 = arith.constant 0.000000e+00 : f32
    %54 = vector.broadcast %cst_54 : f32 to vector<7x224xf32>
    %55 = arith.maximumf %53, %54 : vector<7x224xf32>
    %c0_55 = arith.constant 0 : index
    %c0_56 = arith.constant 0 : index
    %c0_57 = arith.constant 0 : index
    %56 = vector.load %arg1[%c0_55, %c0_56, %c0_57] : memref<1x1x1xf32, #tpu.memory_space<vmem>>, vector<1x1x1xf32>
    %57 = vector.shape_cast %56 : vector<1x1x1xf32> to vector<1x1xf32>
    %c0_58 = arith.constant 0 : index
    %c0_59 = arith.constant 0 : index
    %58 = vector.load %arg9[%c0_58, %c0_59] : memref<1x16xf32, #tpu.memory_space<vmem>>, vector<1x16xf32>
    %59 = vector.broadcast %57 : vector<1x1xf32> to vector<1x16xf32>
    %60 = arith.mulf %59, %58 : vector<1x16xf32>
    %c0_60 = arith.constant 0 : index
    %c0_61 = arith.constant 0 : index
    %61 = vector.load %arg10[%c0_60, %c0_61] : memref<1x16xf32, #tpu.memory_space<vmem>>, vector<1x16xf32>
    %62 = arith.addf %60, %61 : vector<1x16xf32>
    %cst_62 = arith.constant 0.000000e+00 : f32
    %63 = vector.broadcast %cst_62 : f32 to vector<1x16xf32>
    %64 = arith.maximumf %62, %63 : vector<1x16xf32>
    %c0_63 = arith.constant 0 : index
    %c0_64 = arith.constant 0 : index
    %65 = vector.load %arg11[%c0_63, %c0_64] : memref<16x128xf32, #tpu.memory_space<vmem>>, vector<16x128xf32>
    %cst_65 = arith.constant dense<0.000000e+00> : vector<1x128xf32>
    %66 = tpu.matmul %64, %65, %cst_65 {dimension_numbers = #tpu.dot_dimension_numbers<[1], [0], [0], [1], [0, 0, 1, 1], [], []>} : vector<1x16xf32>, vector<16x128xf32>, vector<1x128xf32> -> vector<1x128xf32>
    %c0_66 = arith.constant 0 : index
    %c0_67 = arith.constant 0 : index
    %67 = vector.load %arg13[%c0_66, %c0_67] : memref<1x128xf32, #tpu.memory_space<vmem>>, vector<1x128xf32>
    %68 = arith.addf %66, %67 : vector<1x128xf32>
    %69 = vector.extract_strided_slice %55 {offsets = [0, 0], sizes = [1, 224], strides = [1, 1]} : vector<7x224xf32> to vector<1x224xf32>
    %c0_68 = arith.constant 0 : index
    %c0_69 = arith.constant 0 : index
    %70 = vector.load %arg12[%c0_68, %c0_69] : memref<1568x128xf32, #tpu.memory_space<vmem>>, vector<224x128xf32>
    %cst_70 = arith.constant dense<0.000000e+00> : vector<1x128xf32>
    %71 = tpu.matmul %69, %70, %cst_70 {dimension_numbers = #tpu.dot_dimension_numbers<[1], [0], [0], [1], [0, 0, 1, 1], [], []>} : vector<1x224xf32>, vector<224x128xf32>, vector<1x128xf32> -> vector<1x128xf32>
    %72 = arith.addf %68, %71 : vector<1x128xf32>
    %73 = vector.extract_strided_slice %55 {offsets = [1, 0], sizes = [1, 224], strides = [1, 1]} : vector<7x224xf32> to vector<1x224xf32>
    %c224 = arith.constant 224 : index
    %c0_71 = arith.constant 0 : index
    %74 = vector.load %arg12[%c224, %c0_71] : memref<1568x128xf32, #tpu.memory_space<vmem>>, vector<224x128xf32>
    %cst_72 = arith.constant dense<0.000000e+00> : vector<1x128xf32>
    %75 = tpu.matmul %73, %74, %cst_72 {dimension_numbers = #tpu.dot_dimension_numbers<[1], [0], [0], [1], [0, 0, 1, 1], [], []>} : vector<1x224xf32>, vector<224x128xf32>, vector<1x128xf32> -> vector<1x128xf32>
    %76 = arith.addf %72, %75 : vector<1x128xf32>
    %77 = vector.extract_strided_slice %55 {offsets = [2, 0], sizes = [1, 224], strides = [1, 1]} : vector<7x224xf32> to vector<1x224xf32>
    %c448 = arith.constant 448 : index
    %c0_73 = arith.constant 0 : index
    %78 = vector.load %arg12[%c448, %c0_73] : memref<1568x128xf32, #tpu.memory_space<vmem>>, vector<224x128xf32>
    %cst_74 = arith.constant dense<0.000000e+00> : vector<1x128xf32>
    %79 = tpu.matmul %77, %78, %cst_74 {dimension_numbers = #tpu.dot_dimension_numbers<[1], [0], [0], [1], [0, 0, 1, 1], [], []>} : vector<1x224xf32>, vector<224x128xf32>, vector<1x128xf32> -> vector<1x128xf32>
    %80 = arith.addf %76, %79 : vector<1x128xf32>
    %81 = vector.extract_strided_slice %55 {offsets = [3, 0], sizes = [1, 224], strides = [1, 1]} : vector<7x224xf32> to vector<1x224xf32>
    %c672 = arith.constant 672 : index
    %c0_75 = arith.constant 0 : index
    %82 = vector.load %arg12[%c672, %c0_75] : memref<1568x128xf32, #tpu.memory_space<vmem>>, vector<224x128xf32>
    %cst_76 = arith.constant dense<0.000000e+00> : vector<1x128xf32>
    %83 = tpu.matmul %81, %82, %cst_76 {dimension_numbers = #tpu.dot_dimension_numbers<[1], [0], [0], [1], [0, 0, 1, 1], [], []>} : vector<1x224xf32>, vector<224x128xf32>, vector<1x128xf32> -> vector<1x128xf32>
    %84 = arith.addf %80, %83 : vector<1x128xf32>
    %85 = vector.extract_strided_slice %55 {offsets = [4, 0], sizes = [1, 224], strides = [1, 1]} : vector<7x224xf32> to vector<1x224xf32>
    %c896 = arith.constant 896 : index
    %c0_77 = arith.constant 0 : index
    %86 = vector.load %arg12[%c896, %c0_77] : memref<1568x128xf32, #tpu.memory_space<vmem>>, vector<224x128xf32>
    %cst_78 = arith.constant dense<0.000000e+00> : vector<1x128xf32>
    %87 = tpu.matmul %85, %86, %cst_78 {dimension_numbers = #tpu.dot_dimension_numbers<[1], [0], [0], [1], [0, 0, 1, 1], [], []>} : vector<1x224xf32>, vector<224x128xf32>, vector<1x128xf32> -> vector<1x128xf32>
    %88 = arith.addf %84, %87 : vector<1x128xf32>
    %89 = vector.extract_strided_slice %55 {offsets = [5, 0], sizes = [1, 224], strides = [1, 1]} : vector<7x224xf32> to vector<1x224xf32>
    %c1120 = arith.constant 1120 : index
    %c0_79 = arith.constant 0 : index
    %90 = vector.load %arg12[%c1120, %c0_79] : memref<1568x128xf32, #tpu.memory_space<vmem>>, vector<224x128xf32>
    %cst_80 = arith.constant dense<0.000000e+00> : vector<1x128xf32>
    %91 = tpu.matmul %89, %90, %cst_80 {dimension_numbers = #tpu.dot_dimension_numbers<[1], [0], [0], [1], [0, 0, 1, 1], [], []>} : vector<1x224xf32>, vector<224x128xf32>, vector<1x128xf32> -> vector<1x128xf32>
    %92 = arith.addf %88, %91 : vector<1x128xf32>
    %93 = vector.extract_strided_slice %55 {offsets = [6, 0], sizes = [1, 224], strides = [1, 1]} : vector<7x224xf32> to vector<1x224xf32>
    %c1344 = arith.constant 1344 : index
    %c0_81 = arith.constant 0 : index
    %94 = vector.load %arg12[%c1344, %c0_81] : memref<1568x128xf32, #tpu.memory_space<vmem>>, vector<224x128xf32>
    %cst_82 = arith.constant dense<0.000000e+00> : vector<1x128xf32>
    %95 = tpu.matmul %93, %94, %cst_82 {dimension_numbers = #tpu.dot_dimension_numbers<[1], [0], [0], [1], [0, 0, 1, 1], [], []>} : vector<1x224xf32>, vector<224x128xf32>, vector<1x128xf32> -> vector<1x128xf32>
    %96 = arith.addf %92, %95 : vector<1x128xf32>
    %cst_83 = arith.constant 0.000000e+00 : f32
    %97 = vector.broadcast %cst_83 : f32 to vector<1x128xf32>
    %98 = arith.maximumf %96, %97 : vector<1x128xf32>
    %c0_84 = arith.constant 0 : index
    %c0_85 = arith.constant 0 : index
    %99 = vector.load %arg14[%c0_84, %c0_85] : memref<1x128xf32, #tpu.memory_space<vmem>>, vector<1x128xf32>
    %100 = arith.mulf %98, %99 : vector<1x128xf32>
    %cst_86 = arith.constant dense<0.000000e+00> : vector<1xf32>
    %101 = vector.multi_reduction <add>, %100, %cst_86 [1] : vector<1x128xf32> to vector<1xf32>
    %102 = vector.shape_cast %101 : vector<1xf32> to vector<1x1xf32>
    %c0_87 = arith.constant 0 : index
    %c0_88 = arith.constant 0 : index
    %103 = vector.load %arg15[%c0_87, %c0_88] : memref<1x1xf32, #tpu.memory_space<vmem>>, vector<1x1xf32>
    %104 = arith.addf %102, %103 : vector<1x1xf32>
    %c0_89 = arith.constant 0 : index
    %c0_90 = arith.constant 0 : index
    %c0_91 = arith.constant 0 : index
    %105 = vector.load %arg16[%c0_89, %c0_90, %c0_91] : memref<1x1x1xf32, #tpu.memory_space<vmem>>, vector<1x1x1xf32>
    %106 = vector.shape_cast %105 : vector<1x1x1xf32> to vector<1x1xf32>
    %107 = vector.shape_cast %104 : vector<1x1xf32> to vector<1x1x1xf32>
    tpu.vector_store %arg16[%c0_89, %c0_90, %c0_91], %107 {strides = array<i32>} : memref<1x1x1xf32, #tpu.memory_space<vmem>>, vector<1x1x1xf32>,
    return
  }
  func.func @transform_0(%arg0: i32) -> (i32, i32, i32) {
    %c0_i32 = arith.constant 0 : i32
    %c0_i32_0 = arith.constant 0 : i32
    %c0_i32_1 = arith.constant 0 : i32
    return %arg0, %c0_i32, %c0_i32_0 : i32, i32, i32
  }
  func.func @transform_1(%arg0: i32) -> (i32, i32, i32) {
    %c0_i32 = arith.constant 0 : i32
    %c0_i32_0 = arith.constant 0 : i32
    %c0_i32_1 = arith.constant 0 : i32
    return %arg0, %c0_i32, %c0_i32_0 : i32, i32, i32
  }
  func.func @transform_2(%arg0: i32) -> (i32, i32, i32) {
    %c0_i32 = arith.constant 0 : i32
    %c0_i32_0 = arith.constant 0 : i32
    %c0_i32_1 = arith.constant 0 : i32
    %c0_i32_2 = arith.constant 0 : i32
    return %c0_i32, %c0_i32_0, %c0_i32_1 : i32, i32, i32
  }
  func.func @transform_3(%arg0: i32) -> (i32, i32, i32) {
    %c0_i32 = arith.constant 0 : i32
    %c0_i32_0 = arith.constant 0 : i32
    %c0_i32_1 = arith.constant 0 : i32
    %c0_i32_2 = arith.constant 0 : i32
    return %c0_i32, %c0_i32_0, %c0_i32_1 : i32, i32, i32
  }
  func.func @transform_4(%arg0: i32) -> (i32, i32) {
    %c0_i32 = arith.constant 0 : i32
    %c0_i32_0 = arith.constant 0 : i32
    %c0_i32_1 = arith.constant 0 : i32
    return %c0_i32, %c0_i32_0 : i32, i32
  }
  func.func @transform_5(%arg0: i32) -> (i32, i32, i32) {
    %c0_i32 = arith.constant 0 : i32
    %c0_i32_0 = arith.constant 0 : i32
    %c0_i32_1 = arith.constant 0 : i32
    %c0_i32_2 = arith.constant 0 : i32
    return %c0_i32, %c0_i32_0, %c0_i32_1 : i32, i32, i32
  }
  func.func @transform_6(%arg0: i32) -> (i32, i32, i32) {
    %c0_i32 = arith.constant 0 : i32
    %c0_i32_0 = arith.constant 0 : i32
    %c0_i32_1 = arith.constant 0 : i32
    %c0_i32_2 = arith.constant 0 : i32
    return %c0_i32, %c0_i32_0, %c0_i32_1 : i32, i32, i32
  }
  func.func @transform_7(%arg0: i32) -> (i32, i32) {
    %c0_i32 = arith.constant 0 : i32
    %c0_i32_0 = arith.constant 0 : i32
    %c0_i32_1 = arith.constant 0 : i32
    return %c0_i32, %c0_i32_0 : i32, i32
  }
  func.func @transform_8(%arg0: i32) -> (i32, i32) {
    %c0_i32 = arith.constant 0 : i32
    %c0_i32_0 = arith.constant 0 : i32
    %c0_i32_1 = arith.constant 0 : i32
    return %c0_i32, %c0_i32_0 : i32, i32
  }
  func.func @transform_9(%arg0: i32) -> (i32, i32) {
    %c0_i32 = arith.constant 0 : i32
    %c0_i32_0 = arith.constant 0 : i32
    %c0_i32_1 = arith.constant 0 : i32
    return %c0_i32, %c0_i32_0 : i32, i32
  }
  func.func @transform_10(%arg0: i32) -> (i32, i32) {
    %c0_i32 = arith.constant 0 : i32
    %c0_i32_0 = arith.constant 0 : i32
    %c0_i32_1 = arith.constant 0 : i32
    return %c0_i32, %c0_i32_0 : i32, i32
  }
  func.func @transform_11(%arg0: i32) -> (i32, i32) {
    %c0_i32 = arith.constant 0 : i32
    %c0_i32_0 = arith.constant 0 : i32
    %c0_i32_1 = arith.constant 0 : i32
    return %c0_i32, %c0_i32_0 : i32, i32
  }
  func.func @transform_12(%arg0: i32) -> (i32, i32) {
    %c0_i32 = arith.constant 0 : i32
    %c0_i32_0 = arith.constant 0 : i32
    %c0_i32_1 = arith.constant 0 : i32
    return %c0_i32, %c0_i32_0 : i32, i32
  }
  func.func @transform_13(%arg0: i32) -> (i32, i32) {
    %c0_i32 = arith.constant 0 : i32
    %c0_i32_0 = arith.constant 0 : i32
    %c0_i32_1 = arith.constant 0 : i32
    return %c0_i32, %c0_i32_0 : i32, i32
  }
  func.func @transform_14(%arg0: i32) -> (i32, i32) {
    %c0_i32 = arith.constant 0 : i32
    %c0_i32_0 = arith.constant 0 : i32
    %c0_i32_1 = arith.constant 0 : i32
    return %c0_i32, %c0_i32_0 : i32, i32
  }
  func.func @transform_15(%arg0: i32) -> (i32, i32, i32) {
    %c0_i32 = arith.constant 0 : i32
    %c0_i32_0 = arith.constant 0 : i32
    %c0_i32_1 = arith.constant 0 : i32
    return %arg0, %c0_i32, %c0_i32_0 : i32, i32, i32
  }
}

</mosaic_0001>

<bundles_post_ra>
// kernel: mine_forward.1
= control target key start
LH: loop header
LB: loop body
LE: loop exit
PB: predicated region body
PF: predicated region fallthrough
CT: control target
= control target key end

     0   :  { %s3010_s0 = inlined_call_operand.vmem [shape: f32[2,1,1], index: 0, kind: input, shape index: {}]   ;;  %s3011_s1 = inlined_call_operand.vmem [shape: f32[2,28,84], index: 1, kind: input, shape index: {}]   ;;  %s3012_s2 = inlined_call_operand.vmem [shape: f32[3,14,28], index: 2, kind: input, shape index: {}]   ;;  %s3013_s3 = inlined_call_operand.vmem [shape: f32[3,84,224], index: 3, kind: input, shape index: {}]   ;;  %s3014_s4 = inlined_call_operand.vmem [shape: f32[1,224], index: 4, kind: input, shape index: {}]   ;;  %s3015_s5 = inlined_call_operand.hbm [shape: f32[3,7,14], index: 5, kind: input, shape index: {}]   ;;  %s3016_s6 = inlined_call_operand.hbm [shape: f32[3,224,224], index: 6, kind: input, shape index: {}]   ;;  %s3017_s7 = inlined_call_operand.vmem [shape: f32[1,224], index: 7, kind: input, shape index: {}]   ;;  %s3018_s8 = inlined_call_operand.vmem [shape: f32[1,16], index: 8, kind: input, shape index: {}]   ;;  %s3019_s9 = inlined_call_operand.vmem [shape: f32[1,16], index: 9, kind: input, shape index: {}]   ;;  %s3020_s10 = inlined_call_operand.hbm [shape: f32[16,128], index: 10, kind: input, shape index: {}]   ;;  %s3021_s11 = inlined_call_operand.hbm [shape: f32[1568,128], index: 11, kind: input, shape index: {}]   ;;  %s3022_s12 = inlined_call_operand.vmem [shape: f32[1,128], index: 12, kind: input, shape index: {}]   ;;  %s3023_s13 = inlined_call_operand.vmem [shape: f32[1,128], index: 13, kind: input, shape index: {}]   ;;  %s3024_s14 = inlined_call_operand.<no memory space> [shape: f32[1,1], index: 14, kind: input, shape index: {}]   ;;  %s3025_s15 = inlined_call_operand.vmem [shape: f32[2,1,1], index: 15, kind: output, shape index: {}]  }
   0x1   :  { %3027 = sst [smem:[#allocation14_spill]] %s3015_s5  ;;  %v20_v0 = vstv %s3024_s14 }
   0x2   :  { %3028 = sst [smem:[#allocation15_spill]] %s3016_s6  ;;  %21 = vst [vmem:[#allocation2] sm:$0x1] %v20_v0 }
   0x3   :  { %3029 = sst [smem:[#allocation16_spill]] %s3025_s15 }
   0x4   :  { %22 = vsyncpa [#allocation4], 0 }
   0x5   :  { %23 = vsyncpa [#allocation6], 0 }
   0x6   :  { %24 = vsyncpa [#allocation9], 0  ;;  %s2583_s20 = smov 0  }
   0x7 LB: > { %3030 = sst [smem:[#allocation13_spill]] %s2489_s20  ;;  %s2592_s14 = sadd.s32 4294967295, %s2489_s20   ;;  %s2489_s20 = sphi %s2583_s20, %s30_s20  }
   0x8   : > { %s3031_s6 = sld [smem:[#allocation15_spill]]  ;;  %p2179_p0 = scmp.ge.s32.totalorder %s2489_s20, 1 }
   0x9   : > { %p386_p1 = scmp.lt.s32.totalorder %s2489_s20, 3  ;;  %p2325_p2 = scmp.eq.s32.totalorder %s2592_s14, 0 }
   0xa   : > { %s2491_s25 = smov [#allocation5]   ;;  %s3033_s5 = sld [smem:[#allocation14_spill]] }
   0xb   : > { %p2597_p3 = pnand %p2179_p0, %p386_p1  ;;  %s422_s26 = sshll.u32 %s2491_s25, 4  ;;  %s423_s26 = int_to_ptr.vmem [resolvable:$true] %s422_s26 }
   0xc   : > { %s2492_s16 = smov [#allocation3]   ;;  %s2493_s18 = smov 256  }
   0xd   : > { %p2312_p4 = pneg %p2597_p3  ;;  %s408_s17 = sshll.u32 %s2492_s16, 4  ;;  %s409_s17 = int_to_ptr.vmem [resolvable:$true] %s408_s17 }
   0xe   : > { %s420_s23 = sshll.u32 %s3031_s6, 4  ;;  %s2494_s19 = smov 16   ;;  %s421_s23 = int_to_ptr.hbm [resolvable:$true] %s420_s23 }
   0xf   : > { %p2608_p5 = pnand %p2325_p2, %p2312_p4  ;;  %s443_s25 = sshll.u32 %s3020_s10, 4  ;;  %s444_s25 = int_to_ptr.hbm [resolvable:$true] %s443_s25 }
  0x10   : > { %s406_s29 = sshll.u32 %s3033_s5, 4  ;;  %s2495_s27 = smov 128   ;;  %s407_s29 = int_to_ptr.hbm [resolvable:$true] %s406_s29 }
  0x11   : > { %2318 = dma.hbm_to_vmem [thread:$0]  (!%p2608_p5), %s421_s23, 21504, %s423_s26, [#allocation6], %s2493_s18, %s2493_s18, %s2494_s19  }
  0x12   : > { %s2496_s28 = smov 8   ;;  %s2497_s5 = smov [#allocation7]  }
  0x13   : > { %2315 = dma.hbm_to_vmem [thread:$0]  (!%p2608_p5), %s407_s29, 384, %s409_s17, [#allocation4], %s2495_s27, %s2495_s27, %s2496_s28  }
  0x14   : > { %s445_s6 = sshll.u32 %s2497_s5, 4  ;;  %s457_s16 = sshll.u32 %s3021_s11, 4  ;;  %s446_s6 = int_to_ptr.vmem [resolvable:$true] %s445_s6  ;;  %s458_s16 = int_to_ptr.hbm [resolvable:$true] %s457_s16 }
  0x15   : > { %2321 = dma.hbm_to_vmem [thread:$0]  (!%p2608_p5), %s444_s25, 256, %s446_s6, [#allocation6], %s2495_s27, %s2495_s27, %s2496_s28  }
  0x16   : > { %s2498_s23 = smov [#allocation8]   ;;  %498 = sbr.rel (%p2597_p3) target bundleno = 1214 (0x4be), region = 80 }
  0x17   : > { %s459_s26 = sshll.u32 %s2498_s23, 4  ;;  %s460_s26 = int_to_ptr.vmem [resolvable:$true] %s459_s26 }
  0x18   : > { %2324 = dma.hbm_to_vmem [thread:$0]  (!%p2608_p5), %s458_s16, 25088, %s460_s26, [#allocation9], %s2495_s27, %s2495_s27, %s2496_s28  }
  0x1b   : > { %2476 = dma.done.wait (%p2325_p2), [#allocation4], 384  }
  0x1c   : > { %2478 = vsyncadd (%p2325_p2), [#allocation4], 4294966912 }
  0x1d   : > { %2480 = dma.done.wait (%p2325_p2), [#allocation6], 21760  }
  0x1e   : > { %2482 = vsyncadd (%p2325_p2), [#allocation6], 4294945536 }
  0x1f   : > { %2484 = dma.done.wait (%p2325_p2), [#allocation9], 25088  }
  0x20   : > { %2486 = vsyncadd (%p2325_p2), [#allocation9], 4294942208  ;;  %p563_p6 = scmp.lt.s32.totalorder %s2592_s14, 1  ;;  %vm587_vm0 = vcmask 1043456   ;;  %v2220_v4 = vld [vmem:[%s3013_s3 + $0x150] sm:$0xf] }
  0x21   : > { %v2221_v5 = vld [vmem:[%s3013_s3 + $0x158] sm:$0xf]  ;;  %v2218_v6 = vld [vmem:[%s3013_s3 + $0x140] sm:$0xff]  ;;  %v2219_v7 = vld [vmem:[%s3013_s3 + $0x148] sm:$0xff]  ;;  %2222 = vmatpush.msk.msra.mxu2 %vm587_vm0, %v2220_v4  ;;  %vm580_vm1 = vcmask 228352   ;;  %vm691_vm2 = vcmask 687104  }
  0x22   : > { %s3038_s14 = smov (!%p563_p6, %s2592_s14), 1  ;;  %2225 = vmatpush.msk.msra.mxu3 %vm587_vm0, %v2221_v5  ;;  %v2195_v9 = vld [vmem:[%s3012_s2 + $0x10] sm:$0xff]  ;;  %v578_v10 = vld [vmem:[%s3012_s2] sm:$0xff]  ;;  %v2217_v12 = vld [vmem:[%s3013_s3 + $0x138] sm:$0xff]  ;;  %vm944_vm3 = vcmask 1045504   ;;  %vm940_vm4 = vcmask 113664  }
  0x23   : > { %s2295_s5 = sshll.u32 %s3038_s14, 5  ;;  %710 = vmatpush.msra.mxu2 %v2218_v6  ;;  %v2216_v11 = vld [vmem:[%s3013_s3 + $0x130] sm:$0xff]  ;;  %v634_v13 = vld [vmem:[%s3013_s3 + $0xa0] sm:$0xf]  ;;  %v635_v14 = vld [vmem:[%s3013_s3 + $0xa8] sm:$0xf]  ;;  %s565_s18 = scalar_lea.vmem %s3010_s0, %s3038_s14 }
  0x24   : > { %s570_s20 = scalar_lea.vmem %s3011_s1, %s2295_s5  ;;  %733 = vmatpush.msra.mxu3 %v2219_v7  ;;  %v2214_v15 = vld [vmem:[%s3013_s3 + $0x120] sm:$0xff]  ;;  %v2215_v16 = vld [vmem:[%s3013_s3 + $0x128] sm:$0xff]  ;;  %v632_v17 = vld [vmem:[%s3013_s3 + $0x90] sm:$0xff]  ;;  %vm1149_vm5 = vcmask 785408   ;;  %vm1528_vm6 = vcmask 130048   ;;  %vm2072_vm7 = vcmask 1040384  }
  0x25   : > { %v2648_v1 = vld [vmem:[%s570_s20 + $0x18] sm:$0xf]  ;;  %v2650_v2 = vld [vmem:[%s570_s20 + $0x10] sm:$0xff]  ;;  %v2656_v3 = vld [vmem:[%s570_s20 + $0x8] sm:$0xff]  ;;  %711 = vmatpush.msra.mxu2 %v2216_v11  ;;  %vm2078_vm8 = vcmask 0  }
  0x26   : > { %2197 = vmatpush.msk.msra.mxu1 %vm587_vm0, %v2648_v1  ;;  %2192 = vmatpush.msk.msra.mxu0 %vm587_vm0, %v2648_v1  ;;  %v2672_v8 = vld [vmem:[%s570_s20] sm:$0xff]  ;;  %v633_v18 = vld [vmem:[%s3013_s3 + $0x98] sm:$0xff]  ;;  %v2212_v19 = vld [vmem:[%s3013_s3 + $0x110] sm:$0xff]  ;;  %s3035_s20 = sld [smem:[#allocation16_spill]] }
  0x27   : > { %734 = vmatpush.msra.mxu3 %v2217_v12  ;;  %v2213_v20 = vld [vmem:[%s3013_s3 + $0x118] sm:$0xff]  ;;  %712 = vmatpush.msra.mxu2 %v2214_v15  ;;  %v630_v21 = vld [vmem:[%s3013_s3 + $0x80] sm:$0xff]  ;;  %v631_v22 = vld [vmem:[%s3013_s3 + $0x88] sm:$0xff] }
  0x28   : > { %658 = vmatpush.msra.mxu1 %v2650_v2  ;;  %604 = vmatpush.msra.mxu0 %v2650_v2  ;;  %v2210_v23 = vld [vmem:[%s3013_s3 + $0x100] sm:$0xff]  ;;  %v2211_v24 = vld [vmem:[%s3013_s3 + $0x108] sm:$0xff]  ;;  %v2196_v25 = vld [vmem:[%s3012_s2 + $0x18] sm:$0x3f] }
  0x29   : > { %735 = vmatpush.msra.mxu3 %v2215_v16  ;;  %v579_v26 = vld [vmem:[%s3012_s2 + $0x8] sm:$0x3f]  ;;  %713 = vmatpush.msra.mxu2 %v2212_v19  ;;  %v2208_v27 = vld [vmem:[%s3013_s3 + $0xf0] sm:$0xff]  ;;  %v2209_v28 = vld [vmem:[%s3013_s3 + $0xf8] sm:$0xff] }
  0x2a   : > { %659 = vmatpush.msra.mxu1 %v2656_v3  ;;  %605 = vmatpush.msra.mxu0 %v2656_v3  ;;  %v628_v29 = vld [vmem:[%s3013_s3 + $0x70] sm:$0xff]  ;;  %v629_v30 = vld [vmem:[%s3013_s3 + $0x78] sm:$0xff]  ;;  %v2206_v31 = vld [vmem:[%s3013_s3 + $0xe0] sm:$0xff] }
  0x2b   : > { %736 = vmatpush.msra.mxu3 %v2213_v20  ;;  %714 = vmatpush.msra.mxu2 %v2210_v23  ;;  %v2207_v32 = vld [vmem:[%s3013_s3 + $0xe8] sm:$0xff]  ;;  %v626_v33 = vld [vmem:[%s3013_s3 + $0x60] sm:$0xff]  ;;  %v2204_v35 = vld [vmem:[%s3013_s3 + $0xd0] sm:$0xff] }
  0x2c   : > { %660 = vmatpush.msra.mxu1 %v2672_v8  ;;  %606 = vmatpush.msra.mxu0 %v2672_v8  ;;  %v627_v34 = vld [vmem:[%s3013_s3 + $0x68] sm:$0xff]  ;;  %v2205_v36 = vld [vmem:[%s3013_s3 + $0xd8] sm:$0xff]  ;;  %v624_v37 = vld [vmem:[%s3013_s3 + $0x50] sm:$0xff]  ;;  %s573_s24 = scalar_lea.vmem %s3035_s20, %s3038_s14 }
  0x2d   : > { %2198 = vmatmul.msk.f32.vlgmr.msra.gmra.mxu1 %vm580_vm1, %v2195_v9  ;;  %2193 = vmatmul.msk.f32.vlgmr.msra.gmra.mxu0 %vm580_vm1, %v578_v10  ;;  %v625_v38 = vld [vmem:[%s3013_s3 + $0x58] sm:$0xff]  ;;  %v2202_v39 = vld [vmem:[%s3013_s3 + $0xc0] sm:$0xff]  ;;  %v2203_v40 = vld [vmem:[%s3013_s3 + $0xc8] sm:$0xff] }
  0x2e   : > { %2228 = vmatpush.msk.msrb.mxu0 %vm587_vm0, %v634_v13  ;;  %2231 = vmatpush.msk.msrb.mxu1 %vm587_vm0, %v635_v14  ;;  %v622_v41 = vld [vmem:[%s3013_s3 + $0x40] sm:$0xff]  ;;  %v623_v42 = vld [vmem:[%s3013_s3 + $0x48] sm:$0xff]  ;;  %v2200_v43 = vld [vmem:[%s3013_s3 + $0xb0] sm:$0xff] }
  0x2f   : > { %737 = vmatpush.msra.mxu3 %v2211_v24  ;;  %715 = vmatpush.msra.mxu2 %v2208_v27  ;;  %v2201_v44 = vld [vmem:[%s3013_s3 + $0xb8] sm:$0xff]  ;;  %v620_v45 = vld [vmem:[%s3013_s3 + $0x30] sm:$0xff]  ;;  %v618_v47 = vld [vmem:[%s3013_s3 + $0x20] sm:$0xff] }
  0x30   : > { %768 = vmatpush.msrb.mxu0 %v632_v17  ;;  %791 = vmatpush.msrb.mxu1 %v633_v18  ;;  %v621_v46 = vld [vmem:[%s3013_s3 + $0x38] sm:$0xff]  ;;  %v619_v48 = vld [vmem:[%s3013_s3 + $0x28] sm:$0xff]  ;;  %v616_v49 = vld [vmem:[%s3013_s3 + $0x10] sm:$0xff] }
  0x31   : > { %738 = vmatpush.msra.mxu3 %v2209_v28  ;;  %716 = vmatpush.msra.mxu2 %v2206_v31  ;;  %v617_v50 = vld [vmem:[%s3013_s3 + $0x18] sm:$0xff]  ;;  %v614_v51 = vld [vmem:[%s3013_s3] sm:$0xff]  ;;  %v615_v52 = vld [vmem:[%s3013_s3 + $0x8] sm:$0xff] }
  0x32   : > { %769 = vmatpush.msrb.mxu0 %v630_v21  ;;  %792 = vmatpush.msrb.mxu1 %v631_v22  ;;  %v2259_v53 = vld [vmem:[%s3013_s3 + $0x200] sm:$0xf]  ;;  %v2260_v54 = vld [vmem:[%s3013_s3 + $0x208] sm:$0xf]  ;;  %v2257_v55 = vld [vmem:[%s3013_s3 + $0x1f0] sm:$0xff] }
  0x33   : > { %739 = vmatpush.msra.mxu3 %v2207_v32  ;;  %717 = vmatpush.msra.mxu2 %v2204_v35  ;;  %v2258_v56 = vld [vmem:[%s3013_s3 + $0x1f8] sm:$0xff]  ;;  %v2234_v61 = vld [vmem:[%s3012_s2 + $0x20] sm:$0xff]  ;;  %v2235_v62 = vld [vmem:[%s3012_s2 + $0x28] sm:$0x3f] }
  0x34   : > { %770 = vmatpush.msrb.mxu0 %v628_v29  ;;  %793 = vmatpush.msrb.mxu1 %v629_v30  ;;  %v2255_v63 = vld [vmem:[%s3013_s3 + $0x1e0] sm:$0xff]  ;;  %v2256_v0 = vld [vmem:[%s3013_s3 + $0x1e8] sm:$0xff]  ;;  %v2249_v5 = vld [vmem:[%s3013_s3 + $0x1b0] sm:$0xff] }
  0x35   : > { %2199 = vmatmul.msk.f32.gmra.mxu1 %vm580_vm1, %v2196_v25  ;;  %2194 = vmatmul.msk.f32.gmra.mxu0 %vm580_vm1, %v579_v26  ;;  %v2252_v4 = vld [vmem:[%s3013_s3 + $0x1c8] sm:$0xff]  ;;  %v2250_v6 = vld [vmem:[%s3013_s3 + $0x1b8] sm:$0xff]  ;;  %v2247_v7 = vld [vmem:[%s3013_s3 + $0x1a0] sm:$0xff] }
  0x36   : > { %771 = vmatpush.msrb.mxu0 %v626_v33  ;;  %794 = vmatpush.msrb.mxu1 %v627_v34  ;;  %v2245_v9 = vld [vmem:[%s3013_s3 + $0x190] sm:$0xff]  ;;  %v2246_v10 = vld [vmem:[%s3013_s3 + $0x198] sm:$0xff]  ;;  %v2243_v11 = vld [vmem:[%s3013_s3 + $0x180] sm:$0xff] }
  0x37   : > { %740 = vmatpush.msra.mxu3 %v2205_v36  ;;  %718 = vmatpush.msra.mxu2 %v2202_v39  ;;  %v2244_v12 = vld [vmem:[%s3013_s3 + $0x188] sm:$0xff]  ;;  %v2241_v13 = vld [vmem:[%s3013_s3 + $0x170] sm:$0xff]  ;;  %v2242_v14 = vld [vmem:[%s3013_s3 + $0x178] sm:$0xff] }
  0x38   : > { %772 = vmatpush.msrb.mxu0 %v624_v37  ;;  %795 = vmatpush.msrb.mxu1 %v625_v38  ;;  %v2239_v15 = vld [vmem:[%s3013_s3 + $0x160] sm:$0xff]  ;;  %v2240_v16 = vld [vmem:[%s3013_s3 + $0x168] sm:$0xff] }
  0x39   : > { %741 = vmatpush.msra.mxu3 %v2203_v40  ;;  %719 = vmatpush.msra.mxu2 %v2200_v43  ;;  %v925_v28 = vld [vmem:[%s3014_s4] sm:$0x3] }
  0x3a   : > { %773 = vmatpush.msrb.mxu0 %v622_v41  ;;  %796 = vmatpush.msrb.mxu1 %v623_v42  ;;  %v928_v33 = vperm.slane %v925_v28, 1  ;;  %v927_v41 = vperm.slane %v925_v28, 0  ;;  %v1099_v28 = vld [vmem:[#allocation5 + $0x1f0] sm:$0xff] }
  0x3b   : > { %742 = vmatpush.msra.mxu3 %v2201_v44  ;;  %2236 = vmatpush.msk.msrb.mxu2 %vm587_vm0, %v2648_v1  ;;  %v2253_v1 = vld [vmem:[%s3013_s3 + $0x1d0] sm:$0xff] }
  0x3c   : > { %774 = vmatpush.msrb.mxu0 %v620_v45  ;;  %797 = vmatpush.msrb.mxu1 %v621_v46  ;;  %v2920_v46 = vld [vmem:[#allocation3 + $0x8] sm:$0x7f] }
  0x3d   : > { %830 = vmatpush.msrb.mxu2 %v2650_v2  ;;  %2261 = vmatpush.msk.msrb.mxu3 %vm587_vm0, %v2259_v53  ;;  %v2254_v2 = vld [vmem:[%s3013_s3 + $0x1d8] sm:$0xff] }
  0x3e   : > { %775 = vmatpush.msrb.mxu0 %v618_v47  ;;  %798 = vmatpush.msrb.mxu1 %v619_v48  ;;  %v1123_v47 = vld [vmem:[#allocation5 + $0x2b0] sm:$0xff]  ;;  %v1148_v48 = vld [vmem:[#allocation5 + $0x378] sm:$0xff] }
  0x3f   : > { %831 = vmatpush.msrb.mxu2 %v2656_v3  ;;  %881 = vmatpush.msrb.mxu3 %v2257_v55  ;;  %v2251_v3 = vld [vmem:[%s3013_s3 + $0x1c0] sm:$0xff]  ;;  %v1144_v55 = vld [vmem:[#allocation5 + $0x358] sm:$0xff] }
  0x40   : > { %776 = vmatpush.msrb.mxu0 %v616_v49  ;;  %799 = vmatpush.msrb.mxu1 %v617_v50 }
  0x41   : > { %832 = vmatpush.msrb.mxu2 %v2672_v8  ;;  %882 = vmatpush.msrb.mxu3 %v2255_v63  ;;  %v2248_v8 = vld [vmem:[%s3013_s3 + $0x1a8] sm:$0xff] }
  0x42   : > { %777 = vmatpush.msrb.mxu0 %v614_v51  ;;  %800 = vmatpush.msrb.mxu1 %v615_v52  ;;  %v1121_v51 = vld [vmem:[#allocation5 + $0x2a0] sm:$0xff]  ;;  %v1146_v52 = vld [vmem:[#allocation5 + $0x368] sm:$0xff] }
  0x43   : > { %883 = vmatpush.msrb.mxu3 %v2253_v1  ;;  %v1138_v63 = vld [vmem:[#allocation5 + $0x328] sm:$0xff] }
  0x44   : > { %2264 = vmatpush.msk.msra.mxu0 %vm587_vm0, %v2260_v54  ;;  %v1119_v54 = vld [vmem:[#allocation5 + $0x290] sm:$0xff]  ;;  %v1122_v1 = vld [vmem:[#allocation5 + $0x2a8] sm:$0xff] }
  0x45   : > { %884 = vmatpush.msrb.mxu3 %v2251_v3  ;;  %v1111_v3 = vld [vmem:[#allocation5 + $0x250] sm:$0xff] }
  0x46   : > { %904 = vmatpush.msra.mxu0 %v2258_v56 }
  0x47   : > { %885 = vmatpush.msrb.mxu3 %v2249_v5  ;;  %v1147_v5 = vld [vmem:[#allocation5 + $0x370] sm:$0xff] }
  0x48   : > { %905 = vmatpush.msra.mxu0 %v2256_v0  ;;  %v1113_v0 = vld [vmem:[#allocation5 + $0x260] sm:$0xff] }
  0x49   : > { %886 = vmatpush.msrb.mxu3 %v2247_v7  ;;  %v1109_v7 = vld [vmem:[#allocation5 + $0x240] sm:$0xff] }
  0x4a   : > { %906 = vmatpush.msra.mxu0 %v2254_v2  ;;  %v1136_v2 = vld [vmem:[#allocation5 + $0x318] sm:$0xff] }
  0x4b   : > { %887 = vmatpush.msrb.mxu3 %v2245_v9  ;;  %v1145_v9 = vld [vmem:[#allocation5 + $0x360] sm:$0xff] }
  0x4c   : > { %907 = vmatpush.msra.mxu0 %v2252_v4  ;;  %v1120_v4 = vld [vmem:[#allocation5 + $0x298] sm:$0xff] }
  0x4d   : > { %888 = vmatpush.msrb.mxu3 %v2243_v11  ;;  %v1107_v11 = vld [vmem:[#allocation5 + $0x230] sm:$0xff] }
  0x4e   : > { %908 = vmatpush.msra.mxu0 %v2250_v6  ;;  %v1134_v6 = vld [vmem:[#allocation5 + $0x308] sm:$0xff] }
  0x4f   : > { %889 = vmatpush.msrb.mxu3 %v2241_v13  ;;  %v1143_v13 = vld [vmem:[#allocation5 + $0x350] sm:$0xff] }
  0x50   : > { %909 = vmatpush.msra.mxu0 %v2248_v8  ;;  %v1118_v8 = vld [vmem:[#allocation5 + $0x288] sm:$0xff] }
  0x51   : > { %890 = vmatpush.msrb.mxu3 %v2239_v15  ;;  %v1105_v15 = vld [vmem:[#allocation5 + $0x220] sm:$0xff] }
  0x52   : > { %910 = vmatpush.msra.mxu0 %v2246_v10  ;;  %v1132_v10 = vld [vmem:[#allocation5 + $0x2f8] sm:$0xff] }
  0x54   : > { %911 = vmatpush.msra.mxu0 %v2244_v12  ;;  %v1116_v12 = vld [vmem:[#allocation5 + $0x278] sm:$0xff] }
  0x56   : > { %912 = vmatpush.msra.mxu0 %v2242_v14  ;;  %v1130_v14 = vld [vmem:[#allocation5 + $0x2e8] sm:$0xff] }
  0x58   : > { %913 = vmatpush.msra.mxu0 %v2240_v16  ;;  %v1114_v16 = vld [vmem:[#allocation5 + $0x268] sm:$0xff] }
  0xaa   : > { %v662_v57 = vpop.f32.mrf.mxu1  ;;  %v608_v58 = vpop.f32.mrf.mxu0 }
  0xab   : > { %2223 = vmatmul.msk.f32.vlgmr.msra.gmra.mxu2 %vm691_vm2, %v662_v57  ;;  %2226 = vmatmul.msk.f32.vlgmr.msra.gmra.mxu3 %vm691_vm2, %v662_v57  ;;  %v939_v57 = vld [vmem:[#allocation3] sm:$0x7f] }
  0xac   : > { %2229 = vmatmul.msk.f32.vlgmr.msrb.gmra.mxu0 %vm691_vm2, %v608_v58  ;;  %2232 = vmatmul.msk.f32.vlgmr.msrb.gmra.mxu1 %vm691_vm2, %v608_v58  ;;  %v1117_v58 = vld [vmem:[#allocation5 + $0x280] sm:$0xff] }
  0xad   : > { %1153 = vmatpush.msrb.mxu0 %v1123_v47  ;;  %v1127_v47 = vld [vmem:[#allocation5 + $0x2d0] sm:$0xff] }
  0xaf   : > { %1154 = vmatpush.msrb.mxu0 %v1121_v51  ;;  %v1125_v51 = vld [vmem:[#allocation5 + $0x2c0] sm:$0xff] }
  0xb1   : > { %1155 = vmatpush.msrb.mxu0 %v1119_v54  ;;  %v1021_v54 = vld [vmem:[#allocation5 + $0xf0] sm:$0xff] }
  0xb2   : > { %v665_v59 = vpop.f32.mrf.mxu1  ;;  %v611_v60 = vpop.f32.mrf.mxu0 }
  0xb3   : > { %2224 = vmatmul.msk.f32.gmra.mxu2 %vm691_vm2, %v665_v59  ;;  %2227 = vmatmul.msk.f32.gmra.mxu3 %vm691_vm2, %v665_v59  ;;  %v1142_v59 = vld [vmem:[#allocation5 + $0x348] sm:$0xff] }
  0xb4   : > { %2230 = vmatmul.msk.f32.gmra.mxu0 %vm691_vm2, %v611_v60  ;;  %2233 = vmatmul.msk.f32.gmra.mxu1 %vm691_vm2, %v611_v60  ;;  %v1140_v60 = vld [vmem:[#allocation5 + $0x338] sm:$0xff] }
  0xb5   : > { %1156 = vmatpush.msrb.mxu0 %v1117_v58  ;;  %v1096_v58 = vld [vmem:[#allocation5 + $0x1d8] sm:$0xff] }
  0xbb   : > { %2237 = vmatmul.msk.f32.vlgmr.msrb.gmra.mxu2 %vm580_vm1, %v2234_v61  ;;  %v1115_v61 = vld [vmem:[#allocation5 + $0x270] sm:$0xff] }
  0xbc   : > { %1157 = vmatpush.msrb.mxu0 %v1115_v61  ;;  %v1017_v61 = vld [vmem:[#allocation5 + $0xd0] sm:$0xff] }
  0xbe   : > { %1158 = vmatpush.msrb.mxu0 %v1113_v0  ;;  %v1002_v0 = vld [vmem:[#allocation5 + $0x58] sm:$0xff] }
  0xc0   : > { %1159 = vmatpush.msrb.mxu0 %v1111_v3  ;;  %v1009_v3 = vld [vmem:[#allocation5 + $0x90] sm:$0xff] }
  0xc2   : > { %1160 = vmatpush.msrb.mxu0 %v1109_v7  ;;  %v1001_v7 = vld [vmem:[#allocation5 + $0x50] sm:$0xff] }
  0xc3   : > { %2238 = vmatmul.msk.f32.gmra.mxu2 %vm580_vm1, %v2235_v62  ;;  %v1124_v62 = vld [vmem:[#allocation5 + $0x2b8] sm:$0xff] }
  0xc4   : > { %1193 = vmatpush.msra.mxu2 %v1124_v62  ;;  %1161 = vmatpush.msrb.mxu0 %v1107_v11  ;;  %v1004_v62 = vld [vmem:[#allocation5 + $0x68] sm:$0xff]  ;;  %v993_v11 = vld [vmem:[#allocation5 + $0x10] sm:$0xff] }
  0xc6   : > { %1194 = vmatpush.msra.mxu2 %v1122_v1  ;;  %1162 = vmatpush.msrb.mxu0 %v1105_v15  ;;  %v1013_v1 = vld [vmem:[#allocation5 + $0xb0] sm:$0xff]  ;;  %v1094_v15 = vld [vmem:[#allocation5 + $0x1c8] sm:$0xff] }
  0xc8   : > { %1195 = vmatpush.msra.mxu2 %v1120_v4  ;;  %v1007_v4 = vld [vmem:[#allocation5 + $0x80] sm:$0xff] }
  0xca   : > { %1196 = vmatpush.msra.mxu2 %v1118_v8  ;;  %v999_v8 = vld [vmem:[#allocation5 + $0x40] sm:$0xff] }
  0xcc   : > { %1197 = vmatpush.msra.mxu2 %v1116_v12  ;;  %v991_v12 = vld [vmem:[#allocation5] sm:$0xff] }
  0xce   : > { %1198 = vmatpush.msra.mxu2 %v1114_v16  ;;  %v1037_v16 = vld [vmem:[#allocation5 + $0x170] sm:$0xff] }
 0x129   : > { %v779_v21 = vpop.f32.mrf.mxu0  ;;  %v802_v24 = vpop.f32.mrf.mxu1 }
 0x12e   : > { %v721_v17 = vpop.f32.mrf.mxu2  ;;  %v744_v22 = vpop.f32.mrf.mxu3 }
 0x12f   : > { %v803_v29 = vadd.f32 %v802_v24, %v744_v22  ;;  %v780_v36 = vadd.f32 %v779_v21, %v721_v17  ;;  %v1141_v17 = vld [vmem:[#allocation5 + $0x340] sm:$0xff]  ;;  %v1139_v21 = vld [vmem:[#allocation5 + $0x330] sm:$0xff]  ;;  %v1126_v22 = vld [vmem:[#allocation5 + $0x2c8] sm:$0xff] }
 0x130   : > { %v1101_v24 = vld [vmem:[#allocation5 + $0x200] sm:$0xff] }
 0x131   : > { %v782_v23 = vpop.f32.mrf.mxu0  ;;  %v805_v27 = vpop.f32.mrf.mxu1 }
 0x136   : > { %v724_v18 = vpop.f32.mrf.mxu2  ;;  %v747_v25 = vpop.f32.mrf.mxu3 }
 0x137   : > { %v806_v31 = vadd.f32 %v805_v27, %v747_v25  ;;  %v783_v39 = vadd.f32 %v782_v23, %v724_v18  ;;  %v1128_v18 = vld [vmem:[#allocation5 + $0x2d8] sm:$0xff]  ;;  %v1137_v25 = vld [vmem:[#allocation5 + $0x320] sm:$0xff]  ;;  %v1020_v27 = vld [vmem:[#allocation5 + $0xe8] sm:$0xff] }
 0x138   : > { %v1022_v23 = vld [vmem:[#allocation5 + $0xf8] sm:$0xff] }
 0x13e   : > { %v834_v19 = vpop.f32.mrf.mxu2 }
 0x13f   : > { %2262 = vmatmul.msk.f32.vlgmr.msrb.gmra.mxu3 %vm691_vm2, %v834_v19  ;;  %2265 = vmatmul.msk.f32.vlgmr.msra.gmra.mxu0 %vm691_vm2, %v834_v19  ;;  %v1103_v19 = vld [vmem:[#allocation5 + $0x210] sm:$0xff] }
 0x140   : > { %1163 = vmatpush.msrb.mxu0 %v1103_v19  ;;  %v1035_v19 = vld [vmem:[#allocation5 + $0x160] sm:$0xff] }
 0x142   : > { %1164 = vmatpush.msrb.mxu0 %v1101_v24  ;;  %v1042_v24 = vld [vmem:[#allocation5 + $0x198] sm:$0xff] }
 0x144   : > { %1165 = vmatpush.msrb.mxu0 %v1099_v28  ;;  %v1029_v28 = vld [vmem:[#allocation5 + $0x130] sm:$0xff] }
 0x146   : > { %v837_v20 = vpop.f32.mrf.mxu2 }
 0x147   : > { %2263 = vmatmul.msk.f32.gmra.mxu3 %vm691_vm2, %v837_v20  ;;  %2266 = vmatmul.msk.f32.gmra.mxu0 %vm691_vm2, %v837_v20  ;;  %v1112_v20 = vld [vmem:[#allocation5 + $0x258] sm:$0xff] }
 0x148   : > { %1199 = vmatpush.msra.mxu2 %v1112_v20  ;;  %v996_v20 = vld [vmem:[#allocation5 + $0x28] sm:$0xff] }
 0x1bc   : > { %v915_v26 = vpop.f32.mrf.mxu0 }
 0x1bd   : > { %v922_v32 = vadd.f32 %v915_v26, %v803_v29  ;;  %v1110_v26 = vld [vmem:[#allocation5 + $0x248] sm:$0xff]  ;;  %v1135_v29 = vld [vmem:[#allocation5 + $0x310] sm:$0xff] }
 0x1be   : > { %1200 = vmatpush.msra.mxu2 %v1110_v26  ;;  %v992_v26 = vld [vmem:[#allocation5 + $0x8] sm:$0xff] }
 0x1bf   : > { %v932_v37 = vadd.f32 %v928_v33, %v922_v32  ;;  %v1097_v32 = vld [vmem:[#allocation5 + $0x1e0] sm:$0xff] }
 0x1c0   : > { %1166 = vmatpush.msrb.mxu0 %v1097_v32  ;;  %v1025_v32 = vld [vmem:[#allocation5 + $0x110] sm:$0xff] }
 0x1c1   : > { %v2916_v44 = vmax.f32 %v932_v37, 0.0  ;;  %v1131_v37 = vld [vmem:[#allocation5 + $0x2f0] sm:$0xff] }
 0x1c2   : > { %v892_v30 = vpop.f32.mrf.mxu3 }
 0x1c3   : > { %v921_v40 = vadd.f32 %v892_v30, %v780_v36  ;;  %v1108_v30 = vld [vmem:[#allocation5 + $0x238] sm:$0xff]  ;;  %v1095_v36 = vld [vmem:[#allocation5 + $0x1d0] sm:$0xff] }
 0x1c4   : > { %v918_v34 = vpop.f32.mrf.mxu0  ;;  %1201 = vmatpush.msra.mxu2 %v1108_v30  ;;  %1167 = vmatpush.msrb.mxu0 %v1095_v36  ;;  %v1027_v30 = vld [vmem:[#allocation5 + $0x120] sm:$0xff]  ;;  %v1030_v36 = vld [vmem:[#allocation5 + $0x138] sm:$0xff] }
 0x1c5   : > { %v924_v35 = vadd.f32 %v918_v34, %v806_v31  ;;  %v931_v49 = vadd.f32 %v927_v41, %v921_v40  ;;  %v1018_v31 = vld [vmem:[#allocation5 + $0xd8] sm:$0xff]  ;;  %v1106_v34 = vld [vmem:[#allocation5 + $0x228] sm:$0xff]  ;;  %v1093_v40 = vld [vmem:[#allocation5 + $0x1c0] sm:$0xff] }
 0x1c6   : > { %1202 = vmatpush.msra.mxu2 %v1106_v34  ;;  %1168 = vmatpush.msrb.mxu0 %v1093_v40  ;;  %v1023_v34 = vld [vmem:[#allocation5 + $0x100] sm:$0xff] }
 0x1c7   : > { %v934_v38 = vadd.f32 %v928_v33, %v924_v35  ;;  %v2927_v56 = vmax.f32 %v931_v49, 0.0  ;;  %v1133_v33 = vld [vmem:[#allocation5 + $0x300] sm:$0xff]  ;;  %v1016_v35 = vld [vmem:[#allocation5 + $0xc8] sm:$0xff]  ;;  %v1010_v49 = vld [vmem:[#allocation5 + $0x98] sm:$0xff] }
 0x1c9   : > { %v2914_v42 = vmax.f32 %v934_v38, 0.0  ;;  %v1104_v38 = vld [vmem:[#allocation5 + $0x218] sm:$0xff] }
 0x1ca   : > { %v895_v43 = vpop.f32.mrf.mxu3  ;;  %1203 = vmatpush.msra.mxu2 %v1104_v38  ;;  %v1026_v38 = vld [vmem:[#allocation5 + $0x118] sm:$0xff] }
 0x1cb   : > { %v923_v45 = vadd.f32 %v895_v43, %v783_v39  ;;  %2273 = vmatpush.msk.msra.mxu3 %vm944_vm3, %v2914_v42  ;;  %v1014_v39 = vld [vmem:[#allocation5 + $0xb8] sm:$0xff]  ;;  %v1102_v43 = vld [vmem:[#allocation5 + $0x208] sm:$0xff] }
 0x1cc   : > { %1204 = vmatpush.msra.mxu2 %v1102_v43 }
 0x1cd   : > { %v933_v50 = vadd.f32 %v927_v41, %v923_v45  ;;  %1087 = vmatpush.msra.mxu3 %v2916_v44  ;;  %v1129_v41 = vld [vmem:[#allocation5 + $0x2e0] sm:$0xff]  ;;  %v1012_v45 = vld [vmem:[#allocation5 + $0xa8] sm:$0xff] }
 0x1ce   : > { %2274 = vmatmul.msk.f32.vlgmr.msra.gmra.mxu3 %vm940_vm4, %v2920_v46 }
 0x1cf   : > { %v2925_v53 = vmax.f32 %v933_v50, 0.0  ;;  %1217 = vmatpush.msrb.mxu3 %v1148_v48  ;;  %v1100_v48 = vld [vmem:[#allocation5 + $0x1f8] sm:$0xff]  ;;  %v1043_v50 = vld [vmem:[#allocation5 + $0x1a0] sm:$0xff] }
 0x1d0   : > { %1205 = vmatpush.msra.mxu2 %v1100_v48  ;;  %v1391_v48 = vld [vmem:[#allocation5 + $0x468] sm:$0xff] }
 0x1d1   : > { %2267 = vmatpush.msk.msra.mxu1 %vm944_vm3, %v2925_v53  ;;  %1218 = vmatpush.msrb.mxu3 %v1146_v52  ;;  %v1098_v52 = vld [vmem:[#allocation5 + $0x1e8] sm:$0xff] }
 0x1d2   : > { %1206 = vmatpush.msra.mxu2 %v1098_v52  ;;  %v1385_v52 = vld [vmem:[#allocation5 + $0x438] sm:$0xff] }
 0x1d3   : > { %966 = vmatpush.msra.mxu1 %v2927_v56  ;;  %1219 = vmatpush.msrb.mxu3 %v1144_v55  ;;  %v1008_v55 = vld [vmem:[#allocation5 + $0x88] sm:$0xff] }
 0x1d4   : > { %2268 = vmatmul.msk.f32.vlgmr.msra.gmra.mxu1 %vm940_vm4, %v939_v57  ;;  %1207 = vmatpush.msra.mxu2 %v1096_v58  ;;  %v1381_v58 = vld [vmem:[#allocation5 + $0x418] sm:$0xff] }
 0x1d5   : > { %2269 = vmatpush.msk.msrb.mxu1 %vm944_vm3, %v2914_v42  ;;  %1220 = vmatpush.msrb.mxu3 %v1142_v59  ;;  %v1019_v59 = vld [vmem:[#allocation5 + $0xe0] sm:$0xff] }
 0x1d6   : > { %1208 = vmatpush.msra.mxu2 %v1094_v15  ;;  %v1368_v15 = vld [vmem:[#allocation5 + $0x3b0] sm:$0xff] }
 0x1d7   : > { %986 = vmatpush.msrb.mxu1 %v2916_v44  ;;  %1221 = vmatpush.msrb.mxu3 %v1140_v60  ;;  %v1006_v60 = vld [vmem:[#allocation5 + $0x78] sm:$0xff] }
 0x1d9   : > { %2271 = vmatpush.msk.msra.mxu1 %vm944_vm3, %v2925_v53  ;;  %1222 = vmatpush.msrb.mxu3 %v1138_v63  ;;  %v1015_v63 = vld [vmem:[#allocation5 + $0xc0] sm:$0xff] }
 0x1db   : > { %1067 = vmatpush.msra.mxu1 %v2927_v56  ;;  %1223 = vmatpush.msrb.mxu3 %v1136_v2  ;;  %v1011_v2 = vld [vmem:[#allocation5 + $0xa0] sm:$0xff] }
 0x1dc   : > { %2270 = vmatmul.msk.f32.vlgmr.msrb.gmra.mxu1 %vm940_vm4, %v939_v57  ;;  %v1041_v57 = vld [vmem:[#allocation5 + $0x190] sm:$0xff] }
 0x1dd   : > { %1177 = vmatpush.msrb.mxu1 %v1147_v5  ;;  %1224 = vmatpush.msrb.mxu3 %v1134_v6  ;;  %v1005_v5 = vld [vmem:[#allocation5 + $0x70] sm:$0xff]  ;;  %v1003_v6 = vld [vmem:[#allocation5 + $0x60] sm:$0xff] }
 0x1df   : > { %1178 = vmatpush.msrb.mxu1 %v1145_v9  ;;  %1225 = vmatpush.msrb.mxu3 %v1132_v10  ;;  %v997_v9 = vld [vmem:[#allocation5 + $0x30] sm:$0xff]  ;;  %v995_v10 = vld [vmem:[#allocation5 + $0x20] sm:$0xff] }
 0x1e1   : > { %1179 = vmatpush.msrb.mxu1 %v1143_v13  ;;  %1226 = vmatpush.msrb.mxu3 %v1130_v14  ;;  %v1039_v13 = vld [vmem:[#allocation5 + $0x180] sm:$0xff]  ;;  %v1000_v14 = vld [vmem:[#allocation5 + $0x48] sm:$0xff] }
 0x1e3   : > { %1180 = vmatpush.msrb.mxu1 %v1141_v17  ;;  %1227 = vmatpush.msrb.mxu3 %v1128_v18  ;;  %v998_v17 = vld [vmem:[#allocation5 + $0x38] sm:$0xff] }
 0x1e4   : > { %2272 = vmatmul.msk.f32.vlgmr.msra.gmra.mxu1 %vm940_vm4, %v2920_v46  ;;  %v1045_v46 = vld [vmem:[#allocation5 + $0x1b0] sm:$0xff]  ;;  %v1046_v18 = vld [vmem:[#allocation5 + $0x1b8] sm:$0xff] }
 0x1e5   : > { %1181 = vmatpush.msrb.mxu1 %v1139_v21  ;;  %1228 = vmatpush.msrb.mxu3 %v1126_v22  ;;  %v1044_v21 = vld [vmem:[#allocation5 + $0x1a8] sm:$0xff]  ;;  %v1033_v22 = vld [vmem:[#allocation5 + $0x150] sm:$0xff] }
 0x1e6   : > { %1260 = vmatpush.msra.mxu0 %v1045_v46  ;;  %1300 = vmatpush.msrb.mxu2 %v1046_v18  ;;  %v1317_v46 = vld [vmem:[#allocation3 + $0x10] sm:$0x7f]  ;;  %v1407_v18 = vld [vmem:[#allocation5 + $0x4e8] sm:$0xff] }
 0x1e7   : > { %1276 = vmatpush.msra.mxu3 %v1022_v23  ;;  %1182 = vmatpush.msrb.mxu1 %v1137_v25  ;;  %v994_v23 = vld [vmem:[#allocation5 + $0x18] sm:$0xff]  ;;  %v1031_v25 = vld [vmem:[#allocation5 + $0x140] sm:$0xff] }
 0x1e8   : > { %1261 = vmatpush.msra.mxu0 %v1043_v50  ;;  %1301 = vmatpush.msrb.mxu2 %v1044_v21  ;;  %v1386_v50 = vld [vmem:[#allocation5 + $0x440] sm:$0xff]  ;;  %v1367_v21 = vld [vmem:[#allocation5 + $0x3a8] sm:$0xff] }
 0x1e9   : > { %1277 = vmatpush.msra.mxu3 %v1020_v27  ;;  %1183 = vmatpush.msrb.mxu1 %v1135_v29  ;;  %v1040_v27 = vld [vmem:[#allocation5 + $0x188] sm:$0xff]  ;;  %v1038_v29 = vld [vmem:[#allocation5 + $0x178] sm:$0xff] }
 0x1ea   : > { %1262 = vmatpush.msra.mxu0 %v1041_v57  ;;  %1302 = vmatpush.msrb.mxu2 %v1042_v24  ;;  %v1380_v57 = vld [vmem:[#allocation5 + $0x410] sm:$0xff]  ;;  %v2499_v24 = vmov 0  }
 0x1eb   : > { %1278 = vmatpush.msra.mxu3 %v1018_v31  ;;  %1184 = vmatpush.msrb.mxu1 %v1133_v33  ;;  %v1036_v31 = vld [vmem:[#allocation5 + $0x168] sm:$0xff]  ;;  %v1034_v33 = vld [vmem:[#allocation5 + $0x158] sm:$0xff] }
 0x1ec   : > { %1263 = vmatpush.msra.mxu0 %v1039_v13  ;;  %1303 = vmatpush.msrb.mxu2 %v1040_v27  ;;  %v1371_v13 = vld [vmem:[#allocation5 + $0x3c8] sm:$0xff]  ;;  %v1365_v27 = vld [vmem:[#allocation5 + $0x398] sm:$0xff] }
 0x1ed   : > { %1279 = vmatpush.msra.mxu3 %v1016_v35  ;;  %1185 = vmatpush.msrb.mxu1 %v1131_v37  ;;  %v1032_v35 = vld [vmem:[#allocation5 + $0x148] sm:$0xff] }
 0x1ee   : > { %1264 = vmatpush.msra.mxu0 %v1037_v16  ;;  %1304 = vmatpush.msrb.mxu2 %v1038_v29  ;;  %v1028_v37 = vld [vmem:[#allocation5 + $0x128] sm:$0xff]  ;;  %v1406_v16 = vld [vmem:[#allocation5 + $0x4e0] sm:$0xff] }
 0x1ef   : > { %1280 = vmatpush.msra.mxu3 %v1014_v39  ;;  %1186 = vmatpush.msrb.mxu1 %v1129_v41  ;;  %v1024_v39 = vld [vmem:[#allocation5 + $0x108] sm:$0xff] }
 0x1f0   : > { %1265 = vmatpush.msra.mxu0 %v1035_v19  ;;  %1305 = vmatpush.msrb.mxu2 %v1036_v31  ;;  %v1366_v19 = vld [vmem:[#allocation5 + $0x3a0] sm:$0xff]  ;;  %v1400_v31 = vld [vmem:[#allocation5 + $0x4b0] sm:$0xff] }
 0x1f1   : > { %1281 = vmatpush.msra.mxu3 %v1012_v45  ;;  %1187 = vmatpush.msrb.mxu1 %v1127_v47  ;;  %v1390_v47 = vld [vmem:[#allocation5 + $0x460] sm:$0xff] }
 0x1f2   : > { %1266 = vmatpush.msra.mxu0 %v1033_v22  ;;  %1306 = vmatpush.msrb.mxu2 %v1034_v33  ;;  %v1405_v22 = vld [vmem:[#allocation5 + $0x4d8] sm:$0xff] }
 0x1f3   : > { %1282 = vmatpush.msra.mxu3 %v1010_v49  ;;  %1188 = vmatpush.msrb.mxu1 %v1125_v51  ;;  %v1388_v49 = vld [vmem:[#allocation5 + $0x450] sm:$0xff]  ;;  %v1401_v33 = vld [vmem:[#allocation5 + $0x4b8] sm:$0xff] }
 0x1f4   : > { %1267 = vmatpush.msra.mxu0 %v1031_v25  ;;  %1307 = vmatpush.msrb.mxu2 %v1032_v35  ;;  %v1384_v51 = vld [vmem:[#allocation5 + $0x430] sm:$0xff]  ;;  %v1399_v35 = vld [vmem:[#allocation5 + $0x4a8] sm:$0xff] }
 0x1f5   : > { %1236 = vmatpush.msra.mxu1 %v1021_v54  ;;  %1283 = vmatpush.msra.mxu3 %v1008_v55  ;;  %v1382_v54 = vld [vmem:[#allocation5 + $0x420] sm:$0xff]  ;;  %v1383_v55 = vld [vmem:[#allocation5 + $0x428] sm:$0xff]  ;;  %v1364_v25 = vld [vmem:[#allocation5 + $0x390] sm:$0xff] }
 0x1f6   : > { %1268 = vmatpush.msra.mxu0 %v1029_v28  ;;  %1308 = vmatpush.msrb.mxu2 %v1030_v36  ;;  %v1403_v28 = vld [vmem:[#allocation5 + $0x4c8] sm:$0xff]  ;;  %v1396_v36 = vld [vmem:[#allocation5 + $0x490] sm:$0xff] }
 0x1f7   : > { %1237 = vmatpush.msra.mxu1 %v1019_v59  ;;  %1284 = vmatpush.msra.mxu3 %v1006_v60  ;;  %v1378_v59 = vld [vmem:[#allocation5 + $0x400] sm:$0xff]  ;;  %v1416_v60 = vld [vmem:[#allocation5 + $0x530] sm:$0xff] }
 0x1f8   : > { %1269 = vmatpush.msra.mxu0 %v1027_v30  ;;  %1309 = vmatpush.msrb.mxu2 %v1028_v37  ;;  %v1362_v30 = vld [vmem:[#allocation5 + $0x380] sm:$0xff]  ;;  %v1397_v37 = vld [vmem:[#allocation5 + $0x498] sm:$0xff] }
 0x1f9   : > { %1238 = vmatpush.msra.mxu1 %v1017_v61  ;;  %1285 = vmatpush.msra.mxu3 %v1004_v62  ;;  %v1379_v61 = vld [vmem:[#allocation5 + $0x408] sm:$0xff]  ;;  %v1417_v62 = vld [vmem:[#allocation5 + $0x538] sm:$0xff] }
 0x1fa   : > { %1270 = vmatpush.msra.mxu0 %v1025_v32  ;;  %1310 = vmatpush.msrb.mxu2 %v1026_v38  ;;  %v1363_v32 = vld [vmem:[#allocation5 + $0x388] sm:$0xff]  ;;  %v1394_v38 = vld [vmem:[#allocation5 + $0x480] sm:$0xff] }
 0x1fb   : > { %1239 = vmatpush.msra.mxu1 %v1015_v63  ;;  %1286 = vmatpush.msra.mxu3 %v1002_v0  ;;  %v1376_v63 = vld [vmem:[#allocation5 + $0x3f0] sm:$0xff]  ;;  %v1414_v0 = vld [vmem:[#allocation5 + $0x520] sm:$0xff] }
 0x1fc   : > { %1271 = vmatpush.msra.mxu0 %v1023_v34  ;;  %1311 = vmatpush.msrb.mxu2 %v1024_v39  ;;  %v1398_v34 = vld [vmem:[#allocation5 + $0x4a0] sm:$0xff]  ;;  %v1579_v39 = vld [vmem:[#allocation8 + $0xd8] sm:$0xff] }
 0x1fd   : > { %1240 = vmatpush.msra.mxu1 %v1013_v1  ;;  %1287 = vmatpush.msra.mxu3 %v1000_v14  ;;  %v1377_v1 = vld [vmem:[#allocation5 + $0x3f8] sm:$0xff] }
 0x1fe   : > { %v1409_v14 = vld [vmem:[#allocation5 + $0x4f8] sm:$0xff]  ;;  %2350 = vset.pattern.permute.xlu0 %v2499_v24 }
 0x1ff   : > { %1241 = vmatpush.msra.mxu1 %v1011_v2  ;;  %1288 = vmatpush.msra.mxu3 %v998_v17  ;;  %v1415_v2 = vld [vmem:[#allocation5 + $0x528] sm:$0xff]  ;;  %v1369_v17 = vld [vmem:[#allocation5 + $0x3b8] sm:$0xff] }
 0x201   : > { %1242 = vmatpush.msra.mxu1 %v1009_v3  ;;  %1289 = vmatpush.msra.mxu3 %v996_v20  ;;  %v1374_v3 = vld [vmem:[#allocation5 + $0x3e0] sm:$0xff]  ;;  %v1404_v20 = vld [vmem:[#allocation5 + $0x4d0] sm:$0xff] }
 0x203   : > { %1243 = vmatpush.msra.mxu1 %v1007_v4  ;;  %1290 = vmatpush.msra.mxu3 %v994_v23  ;;  %v1412_v4 = vld [vmem:[#allocation5 + $0x510] sm:$0xff]  ;;  %v1513_v23 = vld [vmem:[%s565_s18] sm:$0x1] }
 0x204   : > { %1517 = vperm.xlu0 %2350, %v1513_v23   ;;  %v1632_v23 = vld [vmem:[#allocation8 + $0x120] sm:$0xff] }
 0x205   : > { %1244 = vmatpush.msra.mxu1 %v1005_v5  ;;  %1291 = vmatpush.msra.mxu3 %v992_v26  ;;  %v1375_v5 = vld [vmem:[#allocation5 + $0x3e8] sm:$0xff]  ;;  %v1402_v26 = vld [vmem:[#allocation5 + $0x4c0] sm:$0xff] }
 0x207   : > { %1245 = vmatpush.msra.mxu1 %v1003_v6  ;;  %v1413_v6 = vld [vmem:[#allocation5 + $0x518] sm:$0xff] }
 0x209   : > { %1246 = vmatpush.msra.mxu1 %v1001_v7  ;;  %v1372_v7 = vld [vmem:[#allocation5 + $0x3d0] sm:$0xff] }
 0x20b   : > { %1247 = vmatpush.msra.mxu1 %v999_v8  ;;  %v1410_v8 = vld [vmem:[#allocation5 + $0x500] sm:$0xff] }
 0x20d   : > { %1248 = vmatpush.msra.mxu1 %v997_v9  ;;  %v1373_v9 = vld [vmem:[#allocation5 + $0x3d8] sm:$0xff] }
 0x20f   : > { %1249 = vmatpush.msra.mxu1 %v995_v10  ;;  %v1411_v10 = vld [vmem:[#allocation5 + $0x508] sm:$0xff] }
 0x211   : > { %1250 = vmatpush.msra.mxu1 %v993_v11  ;;  %v1370_v11 = vld [vmem:[#allocation5 + $0x3c0] sm:$0xff] }
 0x213   : > { %1251 = vmatpush.msra.mxu1 %v991_v12  ;;  %v1408_v12 = vld [vmem:[#allocation5 + $0x4f0] sm:$0xff] }
 0x251   : > { %v968_v40 = vpop.f32.mrf.mxu1  ;;  %v1089_v41 = vpop.f32.mrf.mxu3 }
 0x252   : > { %2275 = vmatmul.msk.f32.vlgmr.msrb.gmra.mxu1 %vm1149_vm5, %v1089_v41  ;;  %2276 = vmatmul.msk.f32.vlgmr.msrb.gmra.mxu3 %vm1149_vm5, %v1089_v41  ;;  %v1526_v41 = vld [vmem:[#allocation7 + $0x8] sm:$0xff] }
 0x253   : > { %2281 = vmatpush.msk.msrb.mxu1 %vm944_vm3, %v2914_v42  ;;  %v1392_v42 = vld [vmem:[#allocation5 + $0x470] sm:$0xff] }
 0x255   : > { %1356 = vmatpush.msrb.mxu1 %v2916_v44  ;;  %v1393_v44 = vld [vmem:[#allocation5 + $0x478] sm:$0xff] }
 0x256   : > { %1461 = vmatpush.msrb.mxu3 %v1393_v44 }
 0x258   : > { %1462 = vmatpush.msrb.mxu3 %v1391_v48  ;;  %v1576_v48 = vld [vmem:[#allocation8 + $0xc0] sm:$0xff] }
 0x259   : > { %v988_v43 = vpop.f32.mrf.mxu1 }
 0x25a   : > { %1252 = vmatmul.f32.vlgmr.msra.gmra.mxu1 %v968_v40  ;;  %1292 = vmatmul.f32.vlgmr.msra.gmra.mxu3 %v968_v40  ;;  %v1395_v40 = vld [vmem:[#allocation5 + $0x488] sm:$0xff] }
 0x25b   : > { %1485 = vmatpush.msra.mxu1 %v1417_v62  ;;  %v1648_v62 = vld [vmem:[#allocation8 + $0x1a0] sm:$0xff] }
 0x25d   : > { %1486 = vmatpush.msra.mxu1 %v1415_v2  ;;  %v1572_v2 = vld [vmem:[#allocation8 + $0xa0] sm:$0xff] }
 0x25f   : > { %1487 = vmatpush.msra.mxu1 %v1413_v6  ;;  %v1571_v6 = vld [vmem:[#allocation8 + $0x98] sm:$0xff] }
 0x261   : > { %v1069_v45 = vpop.f32.mrf.mxu1  ;;  %1488 = vmatpush.msra.mxu1 %v1411_v10  ;;  %v1570_v10 = vld [vmem:[#allocation8 + $0x90] sm:$0xff] }
 0x262   : > { %1169 = vmatmul.f32.vlgmr.msrb.gmra.mxu0 %v1069_v45  ;;  %1209 = vmatmul.f32.vlgmr.msra.gmra.mxu2 %v1069_v45  ;;  %v1567_v45 = vld [vmem:[#allocation8 + $0x78] sm:$0xff] }
 0x263   : > { %2279 = vmatpush.msk.msrb.mxu0 %vm944_vm3, %v2925_v53  ;;  %2282 = vmatmul.msk.f32.vlgmr.msrb.gmra.mxu1 %vm940_vm4, %v1317_v46  ;;  %v1389_v53 = vld [vmem:[#allocation5 + $0x458] sm:$0xff] }
 0x264   : > { %1421 = vmatpush.msra.mxu2 %v1392_v42  ;;  %1463 = vmatpush.msrb.mxu3 %v1389_v53  ;;  %v1525_v42 = vld [vmem:[#allocation7] sm:$0xff]  ;;  %v1575_v53 = vld [vmem:[#allocation8 + $0xb8] sm:$0xff] }
 0x265   : > { %1336 = vmatpush.msrb.mxu0 %v2927_v56  ;;  %v1387_v56 = vld [vmem:[#allocation5 + $0x448] sm:$0xff]  ;;  %1489 = vmatpush.msra.mxu1 %v1409_v14 }
 0x266   : > { %1422 = vmatpush.msra.mxu2 %v1390_v47  ;;  %1464 = vmatpush.msrb.mxu3 %v1387_v56  ;;  %v1566_v47 = vld [vmem:[#allocation8 + $0x70] sm:$0xff]  ;;  %v1635_v14 = vld [vmem:[#allocation8 + $0x138] sm:$0xff] }
 0x267   : > { %1490 = vmatpush.msra.mxu1 %v1407_v18  ;;  %v1650_v56 = vld [vmem:[#allocation8 + $0x1b0] sm:$0xff] }
 0x268   : > { %1423 = vmatpush.msra.mxu2 %v1388_v49  ;;  %1465 = vmatpush.msrb.mxu3 %v1385_v52  ;;  %v1565_v49 = vld [vmem:[#allocation8 + $0x68] sm:$0xff]  ;;  %v1574_v52 = vld [vmem:[#allocation8 + $0xb0] sm:$0xff] }
 0x269   : > { %1491 = vmatpush.msra.mxu1 %v1405_v22  ;;  %v1634_v18 = vld [vmem:[#allocation8 + $0x130] sm:$0xff]  ;;  %v1556_v22 = vld [vmem:[#allocation8 + $0x20] sm:$0xff] }
 0x26a   : > { %2277 = vmatmul.msk.f32.vlgmr.msra.gmra.mxu0 %vm1149_vm5, %v988_v43  ;;  %2278 = vmatmul.msk.f32.vlgmr.msrb.gmra.mxu2 %vm1149_vm5, %v988_v43  ;;  %v1578_v43 = vld [vmem:[#allocation8 + $0xd0] sm:$0xff] }
 0x26b   : > { %1424 = vmatpush.msra.mxu2 %v1386_v50  ;;  %1466 = vmatpush.msrb.mxu3 %v1383_v55  ;;  %v1651_v50 = vld [vmem:[#allocation8 + $0x1b8] sm:$0xff] }
 0x26c   : > { %1445 = vmatpush.msra.mxu0 %v1416_v60  ;;  %1492 = vmatpush.msra.mxu1 %v1403_v28  ;;  %v1554_v28 = vld [vmem:[#allocation8 + $0x10] sm:$0xff] }
 0x26d   : > { %1425 = vmatpush.msra.mxu2 %v1384_v51  ;;  %1467 = vmatpush.msrb.mxu3 %v1381_v58  ;;  %v1564_v51 = vld [vmem:[#allocation8 + $0x60] sm:$0xff]  ;;  %v1639_v58 = vld [vmem:[#allocation8 + $0x158] sm:$0xff] }
 0x26e   : > { %1446 = vmatpush.msra.mxu0 %v1414_v0  ;;  %1493 = vmatpush.msra.mxu1 %v1401_v33  ;;  %v1638_v0 = vld [vmem:[#allocation8 + $0x150] sm:$0xff]  ;;  %v1788_v33 = vld [vmem:[#allocation8 + $0x318] sm:$0xff] }
 0x26f   : > { %1426 = vmatpush.msra.mxu2 %v1382_v54  ;;  %1468 = vmatpush.msrb.mxu3 %v1379_v61  ;;  %v1649_v54 = vld [vmem:[#allocation8 + $0x1a8] sm:$0xff] }
 0x270   : > { %1447 = vmatpush.msra.mxu0 %v1412_v4  ;;  %1494 = vmatpush.msra.mxu1 %v1399_v35  ;;  %v1573_v61 = vld [vmem:[#allocation8 + $0xa8] sm:$0xff]  ;;  %v1644_v35 = vld [vmem:[#allocation8 + $0x180] sm:$0xff] }
 0x271   : > { %1427 = vmatpush.msra.mxu2 %v1380_v57  ;;  %1469 = vmatpush.msrb.mxu3 %v1377_v1  ;;  %v1563_v57 = vld [vmem:[#allocation8 + $0x58] sm:$0xff]  ;;  %v1561_v4 = vld [vmem:[#allocation8 + $0x48] sm:$0xff] }
 0x272   : > { %2280 = vmatmul.msk.f32.vlgmr.msrb.gmra.mxu0 %vm940_vm4, %v1317_v46  ;;  %1495 = vmatpush.msra.mxu1 %v1397_v37  ;;  %v1577_v46 = vld [vmem:[#allocation8 + $0xc8] sm:$0xff]  ;;  %v1787_v37 = vld [vmem:[#allocation8 + $0x310] sm:$0xff] }
 0x273   : > { %1428 = vmatpush.msra.mxu2 %v1378_v59  ;;  %1470 = vmatpush.msrb.mxu3 %v1375_v5  ;;  %v1637_v5 = vld [vmem:[#allocation8 + $0x148] sm:$0xff] }
 0x274   : > { %1448 = vmatpush.msra.mxu0 %v1410_v8  ;;  %1496 = vmatpush.msra.mxu1 %v1395_v40  ;;  %v1560_v8 = vld [vmem:[#allocation8 + $0x40] sm:$0xff]  ;;  %v1712_v40 = vld [vmem:[#allocation8 + $0x228] sm:$0xff] }
 0x275   : > { %1429 = vmatpush.msra.mxu2 %v1376_v63  ;;  %1471 = vmatpush.msrb.mxu3 %v1373_v9  ;;  %v1562_v63 = vld [vmem:[#allocation8 + $0x50] sm:$0xff]  ;;  %v1636_v9 = vld [vmem:[#allocation8 + $0x140] sm:$0xff] }
 0x276   : > { %1449 = vmatpush.msra.mxu0 %v1408_v12  ;;  %1583 = vmatpush.msrb.mxu1 %v1567_v45  ;;  %v1642_v45 = vld [vmem:[#allocation8 + $0x170] sm:$0xff] }
 0x277   : > { %1430 = vmatpush.msra.mxu2 %v1374_v3  ;;  %1472 = vmatpush.msrb.mxu3 %v1371_v13  ;;  %v1647_v3 = vld [vmem:[#allocation8 + $0x198] sm:$0xff] }
 0x278   : > { %1450 = vmatpush.msra.mxu0 %v1406_v16  ;;  %1584 = vmatpush.msrb.mxu1 %v1566_v47  ;;  %v1559_v13 = vld [vmem:[#allocation8 + $0x38] sm:$0xff]  ;;  %v1569_v16 = vld [vmem:[#allocation8 + $0x88] sm:$0xff] }
 0x279   : > { %1431 = vmatpush.msra.mxu2 %v1372_v7  ;;  %1473 = vmatpush.msrb.mxu3 %v1369_v17  ;;  %v1646_v7 = vld [vmem:[#allocation8 + $0x190] sm:$0xff]  ;;  %v1641_v47 = vld [vmem:[#allocation8 + $0x168] sm:$0xff] }
 0x27a   : > { %1451 = vmatpush.msra.mxu0 %v1404_v20  ;;  %1585 = vmatpush.msrb.mxu1 %v1565_v49  ;;  %v1558_v17 = vld [vmem:[#allocation8 + $0x30] sm:$0xff]  ;;  %v1557_v20 = vld [vmem:[#allocation8 + $0x28] sm:$0xff]  ;;  %v1784_v49 = vld [vmem:[#allocation8 + $0x2f8] sm:$0xff] }
 0x27b   : > { %1432 = vmatpush.msra.mxu2 %v1370_v11  ;;  %1474 = vmatpush.msrb.mxu3 %v1367_v21  ;;  %v1645_v11 = vld [vmem:[#allocation8 + $0x188] sm:$0xff] }
 0x27c   : > { %1452 = vmatpush.msra.mxu0 %v1402_v26  ;;  %1586 = vmatpush.msrb.mxu1 %v1564_v51  ;;  %v1633_v21 = vld [vmem:[#allocation8 + $0x128] sm:$0xff]  ;;  %v1555_v26 = vld [vmem:[#allocation8 + $0x18] sm:$0xff] }
 0x27d   : > { %1433 = vmatpush.msra.mxu2 %v1368_v15  ;;  %1475 = vmatpush.msrb.mxu3 %v1365_v27  ;;  %v1631_v27 = vld [vmem:[#allocation8 + $0x118] sm:$0xff] }
 0x27e   : > { %1453 = vmatpush.msra.mxu0 %v1400_v31  ;;  %1587 = vmatpush.msrb.mxu1 %v1563_v57  ;;  %v1629_v31 = vld [vmem:[#allocation8 + $0x108] sm:$0xff]  ;;  %v1726_v51 = vld [vmem:[#allocation8 + $0x298] sm:$0xff] }
 0x27f   : > { %1434 = vmatpush.msra.mxu2 %v1366_v19  ;;  %1476 = vmatpush.msrb.mxu3 %v1363_v32  ;;  %v1568_v19 = vld [vmem:[#allocation8 + $0x80] sm:$0xff]  ;;  %v1782_v57 = vld [vmem:[#allocation8 + $0x2e8] sm:$0xff] }
 0x280   : > { %1454 = vmatpush.msra.mxu0 %v1398_v34  ;;  %1588 = vmatpush.msrb.mxu1 %v1562_v63  ;;  %v1552_v32 = vld [vmem:[#allocation8] sm:$0xff]  ;;  %v1780_v63 = vld [vmem:[#allocation8 + $0x2d8] sm:$0xff] }
 0x281   : > { %1435 = vmatpush.msra.mxu2 %v1364_v25  ;;  %1682 = vmatpush.msra.mxu3 %v1651_v50  ;;  %v1714_v25 = vld [vmem:[#allocation8 + $0x238] sm:$0xff]  ;;  %v1628_v34 = vld [vmem:[#allocation8 + $0x100] sm:$0xff] }
 0x282   : > { %1455 = vmatpush.msra.mxu0 %v1396_v36  ;;  %1589 = vmatpush.msrb.mxu1 %v1561_v4  ;;  %v1713_v36 = vld [vmem:[#allocation8 + $0x230] sm:$0xff]  ;;  %v1640_v50 = vld [vmem:[#allocation8 + $0x160] sm:$0xff] }
 0x283   : > { %1436 = vmatpush.msra.mxu2 %v1362_v30  ;;  %1683 = vmatpush.msra.mxu3 %v1650_v56  ;;  %v1553_v30 = vld [vmem:[#allocation8 + $0x8] sm:$0xff]  ;;  %v1709_v56 = vld [vmem:[#allocation8 + $0x210] sm:$0xff] }
 0x284   : > { %1456 = vmatpush.msra.mxu0 %v1394_v38  ;;  %1590 = vmatpush.msrb.mxu1 %v1560_v8  ;;  %v1627_v38 = vld [vmem:[#allocation8 + $0xf8] sm:$0xff]  ;;  %v1721_v4 = vld [vmem:[#allocation8 + $0x270] sm:$0xff] }
 0x285   : > { %1607 = vmatpush.msrb.mxu2 %v1579_v39  ;;  %1684 = vmatpush.msra.mxu3 %v1649_v54  ;;  %v1643_v39 = vld [vmem:[#allocation8 + $0x178] sm:$0xff]  ;;  %v1708_v54 = vld [vmem:[#allocation8 + $0x208] sm:$0xff] }
 0x286   : > { %1546 = vmatpush.msrb.mxu0 %v1526_v41  ;;  %1591 = vmatpush.msrb.mxu1 %v1559_v13  ;;  %v1786_v41 = vld [vmem:[#allocation8 + $0x308] sm:$0xff]  ;;  %v1800_v13 = vld [vmem:[#allocation8 + $0x378] sm:$0xff] }
 0x287   : > { %1608 = vmatpush.msrb.mxu2 %v1578_v43  ;;  %1685 = vmatpush.msra.mxu3 %v1648_v62  ;;  %v1626_v43 = vld [vmem:[#allocation8 + $0xf0] sm:$0xff]  ;;  %v1723_v62 = vld [vmem:[#allocation8 + $0x280] sm:$0xff] }
 0x288   : > { %1547 = vmatpush.msrb.mxu0 %v1525_v42  ;;  %1592 = vmatpush.msrb.mxu1 %v1558_v17  ;;  %v1785_v42 = vld [vmem:[#allocation8 + $0x300] sm:$0xff] }
 0x289   : > { %1609 = vmatpush.msrb.mxu2 %v1577_v46  ;;  %1686 = vmatpush.msra.mxu3 %v1647_v3  ;;  %v1711_v46 = vld [vmem:[#allocation8 + $0x220] sm:$0xff]  ;;  %v1704_v3 = vld [vmem:[#allocation8 + $0x1e8] sm:$0xff] }
 0x28a   : > { %1593 = vmatpush.msrb.mxu1 %v1557_v20  ;;  %v1797_v17 = vld [vmem:[#allocation8 + $0x360] sm:$0xff] }
 0x28b   : > { %1610 = vmatpush.msrb.mxu2 %v1576_v48  ;;  %1687 = vmatpush.msra.mxu3 %v1646_v7  ;;  %v1710_v48 = vld [vmem:[#allocation8 + $0x218] sm:$0xff]  ;;  %v1518_v7 = vpop.permute.xlu0 %1517  ;;  %v1703_v20 = vld [vmem:[#allocation8 + $0x1e0] sm:$0xff] }
 0x28c   : > { %1594 = vmatpush.msrb.mxu1 %v1556_v22  ;;  %v1520_v8 = vperm.slane %v1518_v7, 0  ;;  %v1777_v22 = vld [vmem:[#allocation8 + $0x2c0] sm:$0xff]  ;;  %v1861_v7 = vld [vmem:[#allocation8 + $0x3f0] sm:$0xff] }
 0x28d   : > { %1611 = vmatpush.msrb.mxu2 %v1575_v53  ;;  %1688 = vmatpush.msra.mxu3 %v1645_v11  ;;  %v1624_v53 = vld [vmem:[#allocation8 + $0xe0] sm:$0xff] }
 0x28e   : > { %1595 = vmatpush.msrb.mxu1 %v1555_v26  ;;  %v1776_v26 = vld [vmem:[#allocation8 + $0x2b8] sm:$0xff] }
 0x28f   : > { %1612 = vmatpush.msrb.mxu2 %v1574_v52  ;;  %1689 = vmatpush.msra.mxu3 %v1644_v35  ;;  %v1783_v52 = vld [vmem:[#allocation8 + $0x2f0] sm:$0xff] }
 0x290   : > { %1596 = vmatpush.msrb.mxu1 %v1554_v28  ;;  %v1701_v28 = vld [vmem:[#allocation8 + $0x1d0] sm:$0xff] }
 0x291   : > { %1613 = vmatpush.msrb.mxu2 %v1573_v61  ;;  %1690 = vmatpush.msra.mxu3 %v1643_v39  ;;  %v1706_v61 = vld [vmem:[#allocation8 + $0x1f8] sm:$0xff]  ;;  %v1791_v35 = vld [vmem:[#allocation8 + $0x330] sm:$0xff]  ;;  %v1790_v39 = vld [vmem:[#allocation8 + $0x328] sm:$0xff] }
 0x292   : > { %1597 = vmatpush.msrb.mxu1 %v1553_v30  ;;  %v1775_v30 = vld [vmem:[#allocation8 + $0x2b0] sm:$0xff] }
 0x293   : > { %1614 = vmatpush.msrb.mxu2 %v1572_v2  ;;  %1691 = vmatpush.msra.mxu3 %v1642_v45  ;;  %v1779_v2 = vld [vmem:[#allocation8 + $0x2d0] sm:$0xff] }
 0x294   : > { %1598 = vmatpush.msrb.mxu1 %v1552_v32  ;;  %v1700_v32 = vld [vmem:[#allocation8 + $0x1c8] sm:$0xff] }
 0x295   : > { %1615 = vmatpush.msrb.mxu2 %v1571_v6  ;;  %1692 = vmatpush.msra.mxu3 %v1641_v47  ;;  %v1514_v6 = vld [vmem:[%s3018_s8] sm:$0x1] }
 0x297   : > { %1616 = vmatpush.msrb.mxu2 %v1570_v10  ;;  %1693 = vmatpush.msra.mxu3 %v1640_v50  ;;  %v1521_v10 = vmul.f32 %v1520_v8, %v1514_v6  ;;  %v1947_v6 = vld [vmem:[#allocation8 + $0x530] sm:$0xff]  ;;  %v1872_v8 = vld [vmem:[#allocation8 + $0x448] sm:$0xff] }
 0x299   : > { %1617 = vmatpush.msrb.mxu2 %v1569_v16  ;;  %v1798_v16 = vld [vmem:[#allocation8 + $0x368] sm:$0xff] }
 0x29b   : > { %1618 = vmatpush.msrb.mxu2 %v1568_v19  ;;  %v1795_v19 = vld [vmem:[#allocation8 + $0x350] sm:$0xff] }
 0x2cf   : > { %v1190_v29 = vpop.f32.mrf.mxu1 }
 0x2d7   : > { %v1253_v44 = vpop.f32.mrf.mxu1 }
 0x2df   : > { %v1170_v55 = vpop.f32.mrf.mxu0 }
 0x2e0   : > { %v1191_v59 = vadd.f32 %v1190_v29, %v1170_v55  ;;  %v1358_v60 = vpop.f32.mrf.mxu1  ;;  %v1630_v29 = vld [vmem:[#allocation8 + $0x110] sm:$0xff] }
 0x2e1   : > { %2283 = vmatmul.msk.f32.vlgmr.msra.gmra.mxu0 %vm1149_vm5, %v1358_v60  ;;  %2284 = vmatmul.msk.f32.vlgmr.msra.gmra.mxu1 %vm1149_vm5, %v1358_v60  ;;  %v1725_v55 = vld [vmem:[#allocation8 + $0x290] sm:$0xff]  ;;  %v1781_v60 = vld [vmem:[#allocation8 + $0x2e0] sm:$0xff] }
 0x2e2   : > { %v1254_v1 = vadd.f32 %v1253_v44, %v1191_v59  ;;  %1658 = vmatpush.msra.mxu0 %v1639_v58  ;;  %1806 = vmatpush.msra.mxu1 %v1788_v33  ;;  %v1625_v44 = vld [vmem:[#allocation8 + $0xe8] sm:$0xff]  ;;  %v1707_v58 = vld [vmem:[#allocation8 + $0x200] sm:$0xff]  ;;  %v1717_v33 = vld [vmem:[#allocation8 + $0x250] sm:$0xff] }
 0x2e3   : > { %v1724_v59 = vld [vmem:[#allocation8 + $0x288] sm:$0xff] }
 0x2e4   : > { %1659 = vmatpush.msra.mxu0 %v1638_v0  ;;  %1807 = vmatpush.msra.mxu1 %v1787_v37  ;;  %v1705_v0 = vld [vmem:[#allocation8 + $0x1f0] sm:$0xff]  ;;  %v1716_v37 = vld [vmem:[#allocation8 + $0x248] sm:$0xff] }
 0x2e5   : > { %v1210_v45 = vpop.f32.mrf.mxu2 }
 0x2e6   : > { %1660 = vmatpush.msra.mxu0 %v1637_v5  ;;  %1808 = vmatpush.msra.mxu1 %v1786_v41  ;;  %v1778_v5 = vld [vmem:[#allocation8 + $0x2c8] sm:$0xff]  ;;  %v1789_v41 = vld [vmem:[#allocation8 + $0x320] sm:$0xff] }
 0x2e7   : > { %v1273_v12 = vpop.f32.mrf.mxu0 }
 0x2e8   : > { %v2960_v15 = vadd.f32 %v1273_v12, %v1254_v1  ;;  %1661 = vmatpush.msra.mxu0 %v1636_v9  ;;  %1809 = vmatpush.msra.mxu1 %v1785_v42  ;;  %v1722_v1 = vld [vmem:[#allocation8 + $0x278] sm:$0xff]  ;;  %v1522_v9 = vld [vmem:[%s3019_s9] sm:$0x1] }
 0x2e9   : > { %v1523_v11 = vadd.f32 %v1522_v9, %v1521_v10  ;;  %v1935_v9 = vld [vmem:[#allocation8 + $0x4d0] sm:$0xff]  ;;  %v1946_v10 = vld [vmem:[#allocation8 + $0x528] sm:$0xff] }
 0x2ea   : > { %1662 = vmatpush.msra.mxu0 %v1635_v14  ;;  %1810 = vmatpush.msra.mxu1 %v1784_v49  ;;  %v1799_v14 = vld [vmem:[#allocation8 + $0x370] sm:$0xff] }
 0x2eb   : > { %v1524_v12 = vmax.f32 %v1523_v11, 0.0  ;;  %v1503_v49 = vld [vmem:[%s3017_s7] sm:$0x3]  ;;  %v1860_v11 = vld [vmem:[#allocation8 + $0x3e8] sm:$0xff] }
 0x2ec   : > { %1663 = vmatpush.msra.mxu0 %v1634_v18  ;;  %1811 = vmatpush.msra.mxu1 %v1783_v52  ;;  %v1796_v18 = vld [vmem:[#allocation8 + $0x358] sm:$0xff] }
 0x2ed   : > { %2285 = vmatmul.msk.f32.vlgmr.msrb.gmra.mxu0 %vm1528_vm6, %v1524_v12  ;;  %v1313_v42 = vpop.f32.mrf.mxu2  ;;  %v1871_v12 = vld [vmem:[#allocation8 + $0x440] sm:$0xff] }
 0x2ee   : > { %1664 = vmatpush.msra.mxu0 %v1633_v21  ;;  %1812 = vmatpush.msra.mxu1 %v1782_v57  ;;  %v1720_v21 = vld [vmem:[#allocation8 + $0x268] sm:$0xff]  ;;  %v1506_v57 = vperm.slane %v1503_v49, 1 }
 0x2ef   : > { %v1338_v24 = vpop.f32.mrf.mxu0 }
 0x2f0   : > { %1437 = vmatmul.f32.vlgmr.msra.gmra.mxu2 %v1338_v24  ;;  %1477 = vmatmul.f32.vlgmr.msrb.gmra.mxu3 %v1338_v24  ;;  %v1702_v24 = vld [vmem:[#allocation8 + $0x1d8] sm:$0xff] }
 0x2f1   : > { %1665 = vmatpush.msra.mxu0 %v1632_v23  ;;  %1732 = vmatpush.msra.mxu2 %v1714_v25  ;;  %v1794_v23 = vld [vmem:[#allocation8 + $0x348] sm:$0xff]  ;;  %v1719_v25 = vld [vmem:[#allocation8 + $0x260] sm:$0xff] }
 0x2f2   : > { %1756 = vmatpush.msrb.mxu3 %v1726_v51  ;;  %1813 = vmatpush.msra.mxu1 %v1781_v60 }
 0x2f3   : > { %1666 = vmatpush.msra.mxu0 %v1631_v27  ;;  %1733 = vmatpush.msra.mxu2 %v1713_v36  ;;  %v1793_v27 = vld [vmem:[#allocation8 + $0x340] sm:$0xff] }
 0x2f4   : > { %1757 = vmatpush.msrb.mxu3 %v1725_v55  ;;  %1814 = vmatpush.msra.mxu1 %v1780_v63  ;;  %v1699_v36 = vld [vmem:[#allocation8 + $0x1c0] sm:$0xff] }
 0x2f5   : > { %1667 = vmatpush.msra.mxu0 %v1630_v29  ;;  %1734 = vmatpush.msra.mxu2 %v1712_v40  ;;  %v1718_v29 = vld [vmem:[#allocation8 + $0x258] sm:$0xff]  ;;  %v1715_v40 = vld [vmem:[#allocation8 + $0x240] sm:$0xff] }
 0x2f6   : > { %1758 = vmatpush.msrb.mxu3 %v1724_v59  ;;  %1815 = vmatpush.msra.mxu1 %v1779_v2 }
 0x2f7   : > { %1668 = vmatpush.msra.mxu0 %v1629_v31  ;;  %1735 = vmatpush.msra.mxu2 %v1711_v46  ;;  %v1792_v31 = vld [vmem:[#allocation8 + $0x338] sm:$0xff] }
 0x2f8   : > { %1759 = vmatpush.msrb.mxu3 %v1723_v62  ;;  %1816 = vmatpush.msra.mxu1 %v1778_v5  ;;  %v1936_v5 = vld [vmem:[#allocation8 + $0x4d8] sm:$0xff] }
 0x2f9   : > { %1669 = vmatpush.msra.mxu0 %v1628_v34  ;;  %1736 = vmatpush.msra.mxu2 %v1710_v48  ;;  %v1774_v34 = vld [vmem:[#allocation8 + $0x2a8] sm:$0xff] }
 0x2fa   : > { %1760 = vmatpush.msrb.mxu3 %v1722_v1  ;;  %1817 = vmatpush.msra.mxu1 %v1777_v22  ;;  %v1948_v1 = vld [vmem:[#allocation8 + $0x538] sm:$0xff] }
 0x2fb   : > { %1670 = vmatpush.msra.mxu0 %v1627_v38  ;;  %1737 = vmatpush.msra.mxu2 %v1709_v56  ;;  %v1773_v38 = vld [vmem:[#allocation8 + $0x2a0] sm:$0xff] }
 0x2fc   : > { %1761 = vmatpush.msrb.mxu3 %v1721_v4  ;;  %1818 = vmatpush.msra.mxu1 %v1776_v26  ;;  %v1862_v4 = vld [vmem:[#allocation8 + $0x3f8] sm:$0xff] }
 0x2fd   : > { %1671 = vmatpush.msra.mxu0 %v1626_v43  ;;  %1738 = vmatpush.msra.mxu2 %v1708_v54  ;;  %v1230_v43 = vpop.f32.mrf.mxu3  ;;  %v1505_v54 = vperm.slane %v1503_v49, 0  ;;  %v1932_v26 = vld [vmem:[#allocation8 + $0x4b8] sm:$0xff]  ;;  %v1863_v49 = vld [vmem:[#allocation8 + $0x400] sm:$0xff] }
 0x2fe   : > { %1762 = vmatpush.msrb.mxu3 %v1720_v21  ;;  %1819 = vmatpush.msra.mxu1 %v1775_v30  ;;  %v1944_v21 = vld [vmem:[#allocation8 + $0x518] sm:$0xff]  ;;  %v1931_v30 = vld [vmem:[#allocation8 + $0x4b0] sm:$0xff] }
 0x2ff   : > { %1672 = vmatpush.msra.mxu0 %v1625_v44  ;;  %1739 = vmatpush.msra.mxu2 %v1707_v58  ;;  %v1231_v44 = vadd.f32 %v1230_v43, %v1210_v45  ;;  %v1928_v43 = vld [vmem:[#allocation8 + $0x498] sm:$0xff]  ;;  %v1939_v45 = vld [vmem:[#allocation8 + $0x4f0] sm:$0xff] }
 0x300   : > { %1763 = vmatpush.msrb.mxu3 %v1719_v25  ;;  %1820 = vmatpush.msra.mxu1 %v1774_v34  ;;  %v1869_v25 = vld [vmem:[#allocation8 + $0x430] sm:$0xff]  ;;  %v1930_v34 = vld [vmem:[#allocation8 + $0x4a8] sm:$0xff] }
 0x301   : > { %1673 = vmatpush.msra.mxu0 %v1624_v53  ;;  %1740 = vmatpush.msra.mxu2 %v1706_v61 }
 0x302   : > { %1764 = vmatpush.msrb.mxu3 %v1718_v29  ;;  %1821 = vmatpush.msra.mxu1 %v1773_v38  ;;  %v1868_v29 = vld [vmem:[#allocation8 + $0x428] sm:$0xff]  ;;  %v1929_v38 = vld [vmem:[#allocation8 + $0x4a0] sm:$0xff] }
 0x303   : > { %1741 = vmatpush.msra.mxu2 %v1705_v0  ;;  %1830 = vmatpush.msrb.mxu0 %v1800_v13  ;;  %v1874_v0 = vld [vmem:[#allocation8 + $0x458] sm:$0xff]  ;;  %v1934_v13 = vld [vmem:[#allocation8 + $0x4c8] sm:$0xff] }
 0x304   : > { %1765 = vmatpush.msrb.mxu3 %v1717_v33  ;;  %v1867_v33 = vld [vmem:[#allocation8 + $0x420] sm:$0xff] }
 0x305   : > { %1742 = vmatpush.msra.mxu2 %v1704_v3  ;;  %1831 = vmatpush.msrb.mxu0 %v1799_v14  ;;  %v1293_v46 = vpop.f32.mrf.mxu3  ;;  %v1945_v14 = vld [vmem:[#allocation8 + $0x520] sm:$0xff] }
 0x306   : > { %1766 = vmatpush.msrb.mxu3 %v1716_v37  ;;  %v1294_v47 = vadd.f32 %v1293_v46, %v1231_v44  ;;  %v1866_v37 = vld [vmem:[#allocation8 + $0x418] sm:$0xff]  ;;  %v1853_v46 = vld [vmem:[#allocation8 + $0x3b0] sm:$0xff] }
 0x307   : > { %1832 = vmatpush.msrb.mxu0 %v1798_v16  ;;  %1743 = vmatpush.msra.mxu2 %v1703_v20  ;;  %v1933_v20 = vld [vmem:[#allocation8 + $0x4c0] sm:$0xff]  ;;  %v1927_v44 = vld [vmem:[#allocation8 + $0x490] sm:$0xff] }
 0x308   : > { %1767 = vmatpush.msrb.mxu3 %v1715_v40  ;;  %v1314_v50 = vadd.f32 %v1313_v42, %v1294_v47  ;;  %v1854_v40 = vld [vmem:[#allocation8 + $0x3b8] sm:$0xff]  ;;  %v1864_v42 = vld [vmem:[#allocation8 + $0x408] sm:$0xff] }
 0x309   : > { %1833 = vmatpush.msrb.mxu0 %v1797_v17  ;;  %1744 = vmatpush.msra.mxu2 %v1702_v24  ;;  %v1858_v24 = vld [vmem:[#allocation8 + $0x3d8] sm:$0xff]  ;;  %v1938_v47 = vld [vmem:[#allocation8 + $0x4e8] sm:$0xff] }
 0x30b   : > { %1834 = vmatpush.msrb.mxu0 %v1796_v18  ;;  %1745 = vmatpush.msra.mxu2 %v1701_v28  ;;  %v1859_v18 = vld [vmem:[#allocation8 + $0x3e0] sm:$0xff]  ;;  %v1857_v28 = vld [vmem:[#allocation8 + $0x3d0] sm:$0xff] }
 0x30d   : > { %1835 = vmatpush.msrb.mxu0 %v1795_v19  ;;  %1746 = vmatpush.msra.mxu2 %v1700_v32  ;;  %v1870_v19 = vld [vmem:[#allocation8 + $0x438] sm:$0xff]  ;;  %v1856_v32 = vld [vmem:[#allocation8 + $0x3c8] sm:$0xff] }
 0x30f   : > { %1836 = vmatpush.msrb.mxu0 %v1794_v23  ;;  %1747 = vmatpush.msra.mxu2 %v1699_v36  ;;  %v1855_v36 = vld [vmem:[#allocation8 + $0x3c0] sm:$0xff] }
 0x311   : > { %1837 = vmatpush.msrb.mxu0 %v1793_v27  ;;  %v1943_v27 = vld [vmem:[#allocation8 + $0x510] sm:$0xff] }
 0x313   : > { %1838 = vmatpush.msrb.mxu0 %v1792_v31  ;;  %v1942_v31 = vld [vmem:[#allocation8 + $0x508] sm:$0xff] }
 0x315   : > { %1839 = vmatpush.msrb.mxu0 %v1791_v35  ;;  %v1941_v35 = vld [vmem:[#allocation8 + $0x500] sm:$0xff] }
 0x317   : > { %1840 = vmatpush.msrb.mxu0 %v1790_v39  ;;  %v1940_v39 = vld [vmem:[#allocation8 + $0x4f8] sm:$0xff] }
 0x319   : > { %1841 = vmatpush.msrb.mxu0 %v1789_v41  ;;  %v1865_v41 = vld [vmem:[#allocation8 + $0x410] sm:$0xff] }
 0x35e   : > { %v1458_v48 = vpop.f32.mrf.mxu0  ;;  %v1498_v53 = vpop.f32.mrf.mxu1 }
 0x373   : > { %v1438_v56 = vpop.f32.mrf.mxu2  ;;  %v1478_v51 = vpop.f32.mrf.mxu3 }
 0x374   : > { %v1459_v52 = vadd.f32 %v1458_v48, %v1438_v56  ;;  %v1499_v55 = vadd.f32 %v1498_v53, %v1478_v51  ;;  %v1852_v48 = vld [vmem:[#allocation8 + $0x3a8] sm:$0xff] }
 0x375   : > { %v1926_v53 = vld [vmem:[#allocation8 + $0x488] sm:$0xff] }
 0x376   : > { %v1501_v58 = vadd.f32 %v1459_v52, %v2960_v15  ;;  %v1502_v59 = vadd.f32 %v1499_v55, %v1314_v50  ;;  %v1873_v15 = vld [vmem:[#allocation8 + $0x450] sm:$0xff]  ;;  %v1937_v50 = vld [vmem:[#allocation8 + $0x4e0] sm:$0xff]  ;;  %v2010_v52 = vld [vmem:[#allocation8 + $0x5b8] sm:$0xff] }
 0x377   : > { %v1925_v55 = vld [vmem:[#allocation8 + $0x480] sm:$0xff] }
 0x378   : > { %v1509_v60 = vadd.f32 %v1505_v54, %v1501_v58  ;;  %v1510_v61 = vadd.f32 %v1506_v57, %v1502_v59  ;;  %v1851_v54 = vld [vmem:[#allocation8 + $0x3a0] sm:$0xff]  ;;  %v2009_v57 = vld [vmem:[#allocation8 + $0x5b0] sm:$0xff]  ;;  %v1850_v58 = vld [vmem:[#allocation8 + $0x398] sm:$0xff] }
 0x379   : > { %v1924_v59 = vld [vmem:[#allocation8 + $0x478] sm:$0xff] }
 0x37a   : > { %v2972_v62 = vmax.f32 %v1509_v60, 0.0  ;;  %v2974_v63 = vmax.f32 %v1510_v61, 0.0  ;;  %v2008_v60 = vld [vmem:[#allocation8 + $0x5a8] sm:$0xff]  ;;  %v1849_v61 = vld [vmem:[#allocation8 + $0x390] sm:$0xff] }
 0x37c   : > { %1599 = vmatmul.f32.vlgmr.msrb.gmra.mxu1 %v2972_v62  ;;  %2286 = vmatmul.msk.f32.vlgmr.msrb.gmra.mxu2 %vm1149_vm5, %v2974_v63  ;;  %v1653_v2 = vrot.slane %v2972_v62, 1  ;;  %v1654_v3 = vrot.slane %v2974_v63, 1  ;;  %v1727_v16 = vrot.slane %v2972_v62, 2  ;;  %v1801_v17 = vrot.slane %v2972_v62, 3 }
 0x37d   : > { %1904 = vmatpush.msrb.mxu2 %v1874_v0  ;;  %1978 = vmatpush.msrb.mxu1 %v1948_v1  ;;  %v1728_v22 = vrot.slane %v2974_v63, 2  ;;  %v1802_v23 = vrot.slane %v2974_v63, 3  ;;  %v1876_v56 = vrot.slane %v2974_v63, 4  ;;  %v1950_v51 = vrot.slane %v2974_v63, 5  ;;  %v1923_v0 = vld [vmem:[#allocation8 + $0x470] sm:$0xff]  ;;  %v2007_v1 = vld [vmem:[#allocation8 + $0x5a0] sm:$0xff] }
 0x37e   : > { %1674 = vmatmul.f32.vlgmr.msra.gmra.mxu0 %v1653_v2  ;;  %2287 = vmatmul.msk.f32.vlgmr.msra.gmra.mxu3 %vm1149_vm5, %v1654_v3  ;;  %v1848_v2 = vld [vmem:[#allocation8 + $0x388] sm:$0xff] }
 0x37f   : > { %1880 = vmatpush.msra.mxu3 %v1862_v4  ;;  %1905 = vmatpush.msrb.mxu2 %v1873_v15  ;;  %v1922_v3 = vld [vmem:[#allocation8 + $0x468] sm:$0xff]  ;;  %v2006_v4 = vld [vmem:[#allocation8 + $0x598] sm:$0xff]  ;;  %v1847_v15 = vld [vmem:[#allocation8 + $0x380] sm:$0xff] }
 0x380   : > { %1954 = vmatpush.msra.mxu0 %v1936_v5  ;;  %1979 = vmatpush.msrb.mxu1 %v1947_v6  ;;  %v1921_v5 = vld [vmem:[#allocation8 + $0x460] sm:$0xff]  ;;  %v1875_v6 = vrot.slane %v2972_v62, 4 }
 0x381   : > { %1881 = vmatpush.msra.mxu3 %v1861_v7  ;;  %1906 = vmatpush.msrb.mxu2 %v1872_v8  ;;  %v2005_v7 = vld [vmem:[#allocation8 + $0x590] sm:$0xff]  ;;  %v1949_v8 = vrot.slane %v2972_v62, 5 }
 0x382   : > { %1955 = vmatpush.msra.mxu0 %v1935_v9  ;;  %1980 = vmatpush.msrb.mxu1 %v1946_v10  ;;  %v2022_v9 = vld [vmem:[#allocation8 + $0x618] sm:$0xff]  ;;  %v2004_v10 = vld [vmem:[#allocation8 + $0x588] sm:$0xff] }
 0x383   : > { %1882 = vmatpush.msra.mxu3 %v1860_v11  ;;  %1907 = vmatpush.msrb.mxu2 %v1871_v12  ;;  %v2021_v11 = vld [vmem:[#allocation8 + $0x610] sm:$0xff]  ;;  %v2003_v12 = vld [vmem:[#allocation8 + $0x580] sm:$0xff] }
 0x384   : > { %1956 = vmatpush.msra.mxu0 %v1934_v13  ;;  %1981 = vmatpush.msrb.mxu1 %v1945_v14  ;;  %v2020_v13 = vld [vmem:[#allocation8 + $0x608] sm:$0xff]  ;;  %v2002_v14 = vld [vmem:[#allocation8 + $0x578] sm:$0xff] }
 0x385   : > { %1748 = vmatmul.f32.vlgmr.msra.gmra.mxu2 %v1727_v16  ;;  %1822 = vmatmul.f32.vlgmr.msra.gmra.mxu1 %v1801_v17  ;;  %v2019_v16 = vld [vmem:[#allocation8 + $0x600] sm:$0xff]  ;;  %v2001_v17 = vld [vmem:[#allocation8 + $0x570] sm:$0xff] }
 0x386   : > { %1883 = vmatpush.msra.mxu3 %v1859_v18  ;;  %1908 = vmatpush.msrb.mxu2 %v1870_v19  ;;  %v2018_v18 = vld [vmem:[#allocation8 + $0x5f8] sm:$0xff]  ;;  %v2000_v19 = vld [vmem:[#allocation8 + $0x568] sm:$0xff] }
 0x387   : > { %1957 = vmatpush.msra.mxu0 %v1933_v20  ;;  %1982 = vmatpush.msrb.mxu1 %v1944_v21  ;;  %v2017_v20 = vld [vmem:[#allocation8 + $0x5f0] sm:$0xff]  ;;  %v1999_v21 = vld [vmem:[#allocation8 + $0x560] sm:$0xff] }
 0x388   : > { %2288 = vmatmul.msk.f32.vlgmr.msrb.gmra.mxu3 %vm1149_vm5, %v1728_v22  ;;  %2289 = vmatmul.msk.f32.vlgmr.msrb.gmra.mxu0 %vm1149_vm5, %v1802_v23  ;;  %v2016_v22 = vld [vmem:[#allocation8 + $0x5e8] sm:$0xff]  ;;  %v1998_v23 = vld [vmem:[#allocation8 + $0x558] sm:$0xff] }
 0x389   : > { %1884 = vmatpush.msra.mxu3 %v1858_v24  ;;  %1909 = vmatpush.msrb.mxu2 %v1869_v25  ;;  %v2015_v24 = vld [vmem:[#allocation8 + $0x5e0] sm:$0xff]  ;;  %v1997_v25 = vld [vmem:[#allocation8 + $0x550] sm:$0xff] }
 0x38a   : > { %1958 = vmatpush.msra.mxu0 %v1932_v26  ;;  %1983 = vmatpush.msrb.mxu1 %v1943_v27  ;;  %v2014_v26 = vld [vmem:[#allocation8 + $0x5d8] sm:$0xff]  ;;  %v1996_v27 = vld [vmem:[#allocation8 + $0x548] sm:$0xff] }
 0x38b   : > { %1885 = vmatpush.msra.mxu3 %v1857_v28  ;;  %1910 = vmatpush.msrb.mxu2 %v1868_v29  ;;  %v2013_v28 = vld [vmem:[#allocation8 + $0x5d0] sm:$0xff]  ;;  %v1995_v29 = vld [vmem:[#allocation8 + $0x540] sm:$0xff] }
 0x38c   : > { %1959 = vmatpush.msra.mxu0 %v1931_v30  ;;  %1984 = vmatpush.msrb.mxu1 %v1942_v31  ;;  %v2012_v30 = vld [vmem:[#allocation8 + $0x5c8] sm:$0xff]  ;;  %v2023_v31 = vrot.slane %v2972_v62, 6 }
 0x38d   : > { %1886 = vmatpush.msra.mxu3 %v1856_v32  ;;  %1911 = vmatpush.msrb.mxu2 %v1867_v33  ;;  %v2011_v32 = vld [vmem:[#allocation8 + $0x5c0] sm:$0xff]  ;;  %v2024_v33 = vrot.slane %v2974_v63, 6 }
 0x38e   : > { %1960 = vmatpush.msra.mxu0 %v1930_v34  ;;  %1985 = vmatpush.msrb.mxu1 %v1941_v35  ;;  %v1549_v34 = vpop.f32.mrf.mxu0 }
 0x38f   : > { %1887 = vmatpush.msra.mxu3 %v1855_v36  ;;  %1912 = vmatpush.msrb.mxu2 %v1866_v37  ;;  %v1527_v37 = vld [vmem:[%s3022_s12] sm:$0x1] }
 0x390   : > { %1961 = vmatpush.msra.mxu0 %v1929_v38  ;;  %1986 = vmatpush.msrb.mxu1 %v1940_v39 }
 0x391   : > { %1888 = vmatpush.msra.mxu3 %v1854_v40  ;;  %1913 = vmatpush.msrb.mxu2 %v1865_v41  ;;  %v1550_v40 = vadd.f32 %v1549_v34, %v1527_v37 }
 0x392   : > { %1962 = vmatpush.msra.mxu0 %v1928_v43  ;;  %1987 = vmatpush.msrb.mxu1 %v1939_v45 }
 0x393   : > { %1889 = vmatpush.msra.mxu3 %v1853_v46  ;;  %1914 = vmatpush.msrb.mxu2 %v1864_v42 }
 0x394   : > { %1963 = vmatpush.msra.mxu0 %v1927_v44  ;;  %1988 = vmatpush.msrb.mxu1 %v1938_v47 }
 0x395   : > { %1890 = vmatpush.msra.mxu3 %v1852_v48  ;;  %1915 = vmatpush.msrb.mxu2 %v1863_v49 }
 0x396   : > { %1964 = vmatpush.msra.mxu0 %v1926_v53  ;;  %1989 = vmatpush.msrb.mxu1 %v1937_v50 }
 0x397   : > { %2290 = vmatmul.msk.f32.vlgmr.msrb.gmra.mxu2 %vm1149_vm5, %v1876_v56  ;;  %2291 = vmatmul.msk.f32.vlgmr.msrb.gmra.mxu1 %vm1149_vm5, %v1950_v51 }
 0x398   : > { %2028 = vmatpush.msra.mxu2 %v2010_v52  ;;  %1891 = vmatpush.msra.mxu3 %v1851_v54 }
 0x399   : > { %1965 = vmatpush.msra.mxu0 %v1925_v55 }
 0x39a   : > { %2029 = vmatpush.msra.mxu2 %v2009_v57  ;;  %1892 = vmatpush.msra.mxu3 %v1850_v58 }
 0x39b   : > { %1966 = vmatpush.msra.mxu0 %v1924_v59 }
 0x39c   : > { %2030 = vmatpush.msra.mxu2 %v2008_v60  ;;  %1893 = vmatpush.msra.mxu3 %v1849_v61 }
 0x39d   : > { %1967 = vmatpush.msra.mxu0 %v1923_v0 }
 0x39e   : > { %2031 = vmatpush.msra.mxu2 %v2007_v1  ;;  %1894 = vmatpush.msra.mxu3 %v1848_v2  ;;  %v2070_v1 = vld [vmem:[%s3023_s13] sm:$0x1] }
 0x39f   : > { %1968 = vmatpush.msra.mxu0 %v1922_v3 }
 0x3a0   : > { %2032 = vmatpush.msra.mxu2 %v2006_v4  ;;  %1895 = vmatpush.msra.mxu3 %v1847_v15  ;;  %v2076_v15 = vld [vmem:[#allocation2] sm:$0x1] }
 0x3a1   : > { %1969 = vmatpush.msra.mxu0 %v1921_v5  ;;  %1896 = vmatmul.f32.vlgmr.msra.gmra.mxu3 %v1875_v6 }
 0x3a2   : > { %1970 = vmatmul.f32.vlgmr.msra.gmra.mxu0 %v1949_v8  ;;  %2033 = vmatpush.msra.mxu2 %v2005_v7 }
 0x3a3   : > { %2052 = vmatpush.msrb.mxu3 %v2022_v9 }
 0x3a4   : > { %2034 = vmatpush.msra.mxu2 %v2004_v10 }
 0x3a5   : > { %2053 = vmatpush.msrb.mxu3 %v2021_v11 }
 0x3a6   : > { %2035 = vmatpush.msra.mxu2 %v2003_v12 }
 0x3a7   : > { %2054 = vmatpush.msrb.mxu3 %v2020_v13 }
 0x3a8   : > { %2036 = vmatpush.msra.mxu2 %v2002_v14 }
 0x3a9   : > { %2055 = vmatpush.msrb.mxu3 %v2019_v16 }
 0x3aa   : > { %2037 = vmatpush.msra.mxu2 %v2001_v17 }
 0x3ab   : > { %2056 = vmatpush.msrb.mxu3 %v2018_v18 }
 0x3ac   : > { %2038 = vmatpush.msra.mxu2 %v2000_v19 }
 0x3ad   : > { %2057 = vmatpush.msrb.mxu3 %v2017_v20 }
 0x3ae   : > { %2039 = vmatpush.msra.mxu2 %v1999_v21 }
 0x3af   : > { %2058 = vmatpush.msrb.mxu3 %v2016_v22 }
 0x3b0   : > { %2040 = vmatpush.msra.mxu2 %v1998_v23 }
 0x3b1   : > { %2059 = vmatpush.msrb.mxu3 %v2015_v24 }
 0x3b2   : > { %2041 = vmatpush.msra.mxu2 %v1997_v25 }
 0x3b3   : > { %2060 = vmatpush.msrb.mxu3 %v2014_v26 }
 0x3b4   : > { %2042 = vmatpush.msra.mxu2 %v1996_v27 }
 0x3b5   : > { %2061 = vmatpush.msrb.mxu3 %v2013_v28 }
 0x3b6   : > { %2043 = vmatpush.msra.mxu2 %v1995_v29 }
 0x3b7   : > { %2062 = vmatpush.msrb.mxu3 %v2012_v30  ;;  %2044 = vmatmul.f32.vlgmr.msra.gmra.mxu2 %v2023_v31 }
 0x3b9   : > { %2063 = vmatpush.msrb.mxu3 %v2011_v32 }
 0x3ba   : > { %2292 = vmatmul.msk.f32.vlgmr.msrb.gmra.mxu3 %vm1149_vm5, %v2024_v33 }
 0x3f9   : > { %v1600_v39 = vpop.f32.mrf.mxu1 }
 0x3fb   : > { %v1675_v38 = vpop.f32.mrf.mxu0 }
 0x3ff   : > { %v1620_v36 = vpop.f32.mrf.mxu2 }
 0x400   : > { %v1621_v62 = vadd.f32 %v1620_v36, %v1600_v39 }
 0x401   : > { %v1695_v35 = vpop.f32.mrf.mxu3 }
 0x402   : > { %v1623_v45 = vadd.f32 %v1621_v62, %v1550_v40  ;;  %v1696_v46 = vadd.f32 %v1695_v35, %v1675_v38  ;;  %v1823_v47 = vpop.f32.mrf.mxu1 }
 0x404   : > { %v1698_v44 = vadd.f32 %v1696_v46, %v1623_v45 }
 0x405   : > { %v1843_v63 = vpop.f32.mrf.mxu0 }
 0x406   : > { %v1844_v50 = vadd.f32 %v1843_v63, %v1823_v47 }
 0x408   : > { %v1749_v43 = vpop.f32.mrf.mxu2 }
 0x40b   : > { %v1769_v41 = vpop.f32.mrf.mxu3 }
 0x40c   : > { %v1770_v42 = vadd.f32 %v1769_v41, %v1749_v43 }
 0x40e   : > { %v1772_v49 = vadd.f32 %v1770_v42, %v1698_v44 }
 0x410   : > { %v1846_v51 = vadd.f32 %v1844_v50, %v1772_v49 }
 0x414   : > { %v1991_v55 = vpop.f32.mrf.mxu1 }
 0x41a   : > { %v1917_v53 = vpop.f32.mrf.mxu2 }
 0x41f   : > { %v1971_v52 = vpop.f32.mrf.mxu0 }
 0x420   : > { %v1992_v57 = vadd.f32 %v1991_v55, %v1971_v52 }
 0x424   : > { %v1897_v48 = vpop.f32.mrf.mxu3 }
 0x425   : > { %v1918_v56 = vadd.f32 %v1917_v53, %v1897_v48 }
 0x427   : > { %v1920_v54 = vadd.f32 %v1918_v56, %v1846_v51 }
 0x429   : > { %v1994_v60 = vadd.f32 %v1992_v57, %v1920_v54 }
 0x43a   : > { %v2045_v58 = vpop.f32.mrf.mxu2 }
 0x43d   : > { %v2065_v59 = vpop.f32.mrf.mxu3 }
 0x43e   : > { %v2066_v61 = vadd.f32 %v2065_v59, %v2045_v58 }
 0x440   : > { %v2068_v0 = vadd.f32 %v2066_v61, %v1994_v60 }
 0x442   : > { %v2069_v2 = vmax.f32 %v2068_v0, 0.0 }
 0x444   : > { %v2071_v3 = vmul.f32 %v2070_v1, %v2069_v2 }
 0x446   : > { %v2073_v4 = vsel %vm2072_vm7, %v2071_v3, 0.0 }
 0x447   : > { %2074 = vadd.xlane.f32.xlu0 %v2073_v4 }
 0x4ba   : > { %v2075_v5 = vpop.xlane.xlu0 %2074 }
 0x4bb   : > { %v2077_v6 = vadd.f32 %v2076_v15, %v2075_v5 }
 0x4bd   : > { %2079 = vst.msk [vmem:[%s573_s24] sm:$0x1] %vm2078_vm8, %v2077_v6 }
 0x4be PF: > { %s3036_s29 = sld [smem:[#allocation13_spill]] }
 0x4c4   : > { %s30_s20 = sadd.s32 1, %s3036_s29  }
 0x4c5   : > { %p27_p7 = scmp.ge.s32.totalorder %s30_s20, 4  }
 0x4c7   :  { %29 = sbr.rel (!%p27_p7) target bundleno = 7 (0x7), region = 138 }
 0x4cc   :  { %2097 = vsyncpa [#allocation4], 1 }
 0x4cd   :  { %2099 = vsyncpa [#allocation4 + $0x1], 1 }
 0x4ce   :  { %2100 = vsyncpa [#allocation6], 1 }
 0x4cf   :  { %2101 = vsyncpa [#allocation9], 1 }

</bundles_post_ra>
